<compile_context>
chip_gen: v6e
topology: v6e:2x2x1
jax: 0.10.0
libtpu: 0.0.40
codegen_flags: <defaults>
</compile_context>

<pallas_src>
import functools

import jax
import jax.numpy as jnp
from jax.experimental import pallas as pl
from jax.experimental.pallas import tpu as pltpu

LANE = 128


def _round_up(x, m):
    return ((x + m - 1) // m) * m


# ----------------------------- Pallas kernel ------------------------------ #
def _conv2d_kernel(x_ref, w_ref, b_ref, o_ref, *, kh, kw, stride, oh, ow,
                   apply_relu):
    # x_ref: (1, Hp, Wp, C)    bf16 spatially padded input image (NHWC)
    # w_ref: (KH, KW, C, TOC)  bf16 conv weights for this OC tile
    # b_ref: (1, TOC)          f32 bias for this OC tile
    # o_ref: (1, OH*OW, TOC)   f32 output tile (lane-dense, channels-last)
    x = x_ref[0]                                  # (Hp, Wp, C)
    c = x.shape[-1]
    toc = o_ref.shape[-1]

    acc = jnp.zeros((oh * ow, toc), jnp.float32)
    # Direct conv = sum of KH*KW shifted matmuls (unrolled, static slices).
    for i in range(kh):
        for j in range(kw):
            patch = x[i:i + stride * oh:stride, j:j + stride * ow:stride, :]
            patch = patch.reshape(oh * ow, c)      # layout-preserving fold
            acc = acc + jnp.dot(patch, w_ref[i, j],
                                preferred_element_type=jnp.float32)

    acc = acc + b_ref[...]                         # (1, TOC) broadcasts
    if apply_relu:
        acc = jnp.maximum(acc, 0.0)
    o_ref[0] = acc.astype(o_ref.dtype)


def _conv2d_nhwc_pallas(x_pad, w_khwc, bias2d, *, stride, oh, ow, apply_relu,
                        toc=LANE):
    n, hp, wp, c = x_pad.shape
    kh, kw, _, ocp = w_khwc.shape
    assert ocp % toc == 0

    kernel = functools.partial(_conv2d_kernel, kh=kh, kw=kw, stride=stride,
                               oh=oh, ow=ow, apply_relu=apply_relu)
    return pl.pallas_call(
        kernel,
        out_shape=jax.ShapeDtypeStruct((n, oh * ow, ocp), jnp.float32),
        grid_spec=pltpu.PrefetchScalarGridSpec(
            num_scalar_prefetch=0,
            grid=(n, ocp // toc),
            in_specs=[
                pl.BlockSpec((1, hp, wp, c), lambda b, o: (b, 0, 0, 0)),
                pl.BlockSpec((kh, kw, c, toc), lambda b, o: (0, 0, 0, o)),
                pl.BlockSpec((1, toc), lambda b, o: (0, o)),
            ],
            out_specs=pl.BlockSpec((1, oh * ow, toc), lambda b, o: (b, 0, o)),
        ),
        compiler_params=pltpu.CompilerParams(
            dimension_semantics=("parallel", "parallel"),
            vmem_limit_bytes=32 * 1024 * 1024,
        ),
    )(x_pad, w_khwc, bias2d)


# ------------------------------- JAX glue ---------------------------------- #
def conv2d_module_forward(x, weight, bias, *, stride=1, same_padding=True,
                          relu=True):
    """Forward of the PyTorch Conv2d wrapper (bn=False).

    x:      (N, C, H, W)   float32, NCHW (PyTorch convention)
    weight: (OC, C, KH, KW)
    bias:   (OC,)
    returns (N, OC, OH, OW) float32
    """
    oc, c, kh, kw = weight.shape
    pad = (kh - 1) // 2 if same_padding else 0
    n, _, h, w = x.shape
    oh = (h + 2 * pad - kh) // stride + 1
    ow = (w + 2 * pad - kw) // stride + 1

    # Channels-last + spatial zero-pad; bf16 operands (f32 accumulation in-kernel).
    x_nhwc = jnp.transpose(x, (0, 2, 3, 1)).astype(jnp.bfloat16)
    x_pad = jnp.pad(x_nhwc, ((0, 0), (pad, pad), (pad, pad), (0, 0)))

    # Weights -> (KH, KW, C, OCp), OC padded to a lane-dense multiple of 128.
    ocp = _round_up(oc, LANE)
    w_khwc = jnp.transpose(weight, (2, 3, 1, 0)).astype(jnp.bfloat16)
    w_khwc = jnp.pad(w_khwc, ((0, 0), (0, 0), (0, 0), (0, ocp - oc)))
    bias2d = jnp.pad(bias.astype(jnp.float32), (0, ocp - oc)).reshape(1, ocp)

    y = _conv2d_nhwc_pallas(x_pad, w_khwc, bias2d, stride=stride, oh=oh, ow=ow,
                            apply_relu=relu)                 # (N, OH*OW, OCp)
    y = y.reshape(n, oh, ow, ocp)[..., :oc]                  # drop OC padding
    return jnp.transpose(y, (0, 3, 1, 2))                    # back to NCHW


# --------------------------------- main ------------------------------------ #
if __name__ == "__main__":
    key = jax.random.PRNGKey(0)
    k_x, k_w, k_b = jax.random.split(key, 3)

    N, C, H, W = 2, 4, 16, 16
    OC, KS = 8, 3                                  # kernel_size=3, same_padding

    x = jax.random.normal(k_x, (N, C, H, W), dtype=jnp.float32)
    # Deterministic synthetic params (PyTorch-style uniform fan-in init).
    fan_in = C * KS * KS
    bound = 1.0 / (fan_in ** 0.5)
    weight = jax.random.uniform(k_w, (OC, C, KS, KS), jnp.float32, -bound, bound)
    bias = jax.random.uniform(k_b, (OC,), jnp.float32, -bound, bound)

    y = conv2d_module_forward(x, weight, bias, stride=1, same_padding=True,
                              relu=True)
    y = jax.block_until_ready(y)

    # Sanity check vs XLA conv with matching bf16 operands / f32 accumulation.
    ref = jax.lax.conv_general_dilated(
        x.astype(jnp.bfloat16), weight.astype(jnp.bfloat16),
        window_strides=(1, 1), padding=((1, 1), (1, 1)),
        dimension_numbers=("NCHW", "OIHW", "NCHW"),
        preferred_element_type=jnp.float32)
    ref = jnp.maximum(ref + bias[None, :, None, None], 0.0)

    assert y.shape == (N, OC, H, W)
    assert jnp.allclose(y, ref, atol=1e-3, rtol=1e-3)

    print("KERNEL_OK")
</pallas_src>

<mosaic_0001>
module attributes {stable_mosaic.version = 11 : i64} {
  func.func @_conv2d_kernel(%arg0: i32, %arg1: i32, %arg2: memref<1x18x18x4xbf16, #tpu.memory_space<vmem>>, %arg3: memref<3x3x4x128xbf16, #tpu.memory_space<vmem>>, %arg4: memref<1x128xf32, #tpu.memory_space<vmem>>, %arg5: memref<1x256x128xf32, #tpu.memory_space<vmem>>) attributes {dimension_semantics = [#tpu.dimension_semantics<parallel>, #tpu.dimension_semantics<parallel>], iteration_bounds = array<i64: 2, 1>, scalar_prefetch = 0 : i64, scratch_operands = 0 : i64, tpu.core_type = #tpu.core_type<tc>, window_params = [{transform_indices = @transform_0, window_bounds = array<i64: 1, 18, 18, 4>}, {transform_indices = @transform_1, window_bounds = array<i64: 3, 3, 4, 128>}, {transform_indices = @transform_2, window_bounds = array<i64: 1, 128>}, {transform_indices = @transform_3, window_bounds = array<i64: 1, 256, 128>}]} {
    %c0 = arith.constant 0 : index
    %c0_0 = arith.constant 0 : index
    %c0_1 = arith.constant 0 : index
    %c0_2 = arith.constant 0 : index
    %0 = vector.load %arg2[%c0, %c0_0, %c0_1, %c0_2] : memref<1x18x18x4xbf16, #tpu.memory_space<vmem>>, vector<1x18x18x4xbf16>
    %1 = vector.shape_cast %0 : vector<1x18x18x4xbf16> to vector<18x18x4xbf16>
    %cst = arith.constant 0.000000e+00 : f32
    %2 = vector.broadcast %cst : f32 to vector<256x128xf32>
    %3 = vector.extract_strided_slice %1 {offsets = [0, 0, 0], sizes = [16, 16, 4], strides = [1, 1, 1]} : vector<18x18x4xbf16> to vector<16x16x4xbf16>
    %4 = vector.shape_cast %3 : vector<16x16x4xbf16> to vector<256x4xbf16>
    %c0_3 = arith.constant 0 : index
    %c0_4 = arith.constant 0 : index
    %c0_5 = arith.constant 0 : index
    %c0_6 = arith.constant 0 : index
    %5 = vector.load %arg3[%c0_3, %c0_4, %c0_5, %c0_6] : memref<3x3x4x128xbf16, #tpu.memory_space<vmem>>, vector<1x1x4x128xbf16>
    %6 = vector.shape_cast %5 : vector<1x1x4x128xbf16> to vector<4x128xbf16>
    %cst_7 = arith.constant dense<0.000000e+00> : vector<256x128xf32>
    %7 = tpu.matmul %4, %6, %cst_7 {dimension_numbers = #tpu.dot_dimension_numbers<[1], [0], [0], [1], [0, 0, 1, 1], [], []>} : vector<256x4xbf16>, vector<4x128xbf16>, vector<256x128xf32> -> vector<256x128xf32>
    %8 = arith.addf %2, %7 : vector<256x128xf32>
    %9 = vector.extract_strided_slice %1 {offsets = [0, 1, 0], sizes = [16, 16, 4], strides = [1, 1, 1]} : vector<18x18x4xbf16> to vector<16x16x4xbf16>
    %10 = vector.shape_cast %9 : vector<16x16x4xbf16> to vector<256x4xbf16>
    %c0_8 = arith.constant 0 : index
    %c1 = arith.constant 1 : index
    %c0_9 = arith.constant 0 : index
    %c0_10 = arith.constant 0 : index
    %11 = vector.load %arg3[%c0_8, %c1, %c0_9, %c0_10] : memref<3x3x4x128xbf16, #tpu.memory_space<vmem>>, vector<1x1x4x128xbf16>
    %12 = vector.shape_cast %11 : vector<1x1x4x128xbf16> to vector<4x128xbf16>
    %cst_11 = arith.constant dense<0.000000e+00> : vector<256x128xf32>
    %13 = tpu.matmul %10, %12, %cst_11 {dimension_numbers = #tpu.dot_dimension_numbers<[1], [0], [0], [1], [0, 0, 1, 1], [], []>} : vector<256x4xbf16>, vector<4x128xbf16>, vector<256x128xf32> -> vector<256x128xf32>
    %14 = arith.addf %8, %13 : vector<256x128xf32>
    %15 = vector.extract_strided_slice %1 {offsets = [0, 2, 0], sizes = [16, 16, 4], strides = [1, 1, 1]} : vector<18x18x4xbf16> to vector<16x16x4xbf16>
    %16 = vector.shape_cast %15 : vector<16x16x4xbf16> to vector<256x4xbf16>
    %c0_12 = arith.constant 0 : index
    %c2 = arith.constant 2 : index
    %c0_13 = arith.constant 0 : index
    %c0_14 = arith.constant 0 : index
    %17 = vector.load %arg3[%c0_12, %c2, %c0_13, %c0_14] : memref<3x3x4x128xbf16, #tpu.memory_space<vmem>>, vector<1x1x4x128xbf16>
    %18 = vector.shape_cast %17 : vector<1x1x4x128xbf16> to vector<4x128xbf16>
    %cst_15 = arith.constant dense<0.000000e+00> : vector<256x128xf32>
    %19 = tpu.matmul %16, %18, %cst_15 {dimension_numbers = #tpu.dot_dimension_numbers<[1], [0], [0], [1], [0, 0, 1, 1], [], []>} : vector<256x4xbf16>, vector<4x128xbf16>, vector<256x128xf32> -> vector<256x128xf32>
    %20 = arith.addf %14, %19 : vector<256x128xf32>
    %21 = vector.extract_strided_slice %1 {offsets = [1, 0, 0], sizes = [16, 16, 4], strides = [1, 1, 1]} : vector<18x18x4xbf16> to vector<16x16x4xbf16>
    %22 = vector.shape_cast %21 : vector<16x16x4xbf16> to vector<256x4xbf16>
    %c1_16 = arith.constant 1 : index
    %c0_17 = arith.constant 0 : index
    %c0_18 = arith.constant 0 : index
    %c0_19 = arith.constant 0 : index
    %23 = vector.load %arg3[%c1_16, %c0_17, %c0_18, %c0_19] : memref<3x3x4x128xbf16, #tpu.memory_space<vmem>>, vector<1x1x4x128xbf16>
    %24 = vector.shape_cast %23 : vector<1x1x4x128xbf16> to vector<4x128xbf16>
    %cst_20 = arith.constant dense<0.000000e+00> : vector<256x128xf32>
    %25 = tpu.matmul %22, %24, %cst_20 {dimension_numbers = #tpu.dot_dimension_numbers<[1], [0], [0], [1], [0, 0, 1, 1], [], []>} : vector<256x4xbf16>, vector<4x128xbf16>, vector<256x128xf32> -> vector<256x128xf32>
    %26 = arith.addf %20, %25 : vector<256x128xf32>
    %27 = vector.extract_strided_slice %1 {offsets = [1, 1, 0], sizes = [16, 16, 4], strides = [1, 1, 1]} : vector<18x18x4xbf16> to vector<16x16x4xbf16>
    %28 = vector.shape_cast %27 : vector<16x16x4xbf16> to vector<256x4xbf16>
    %c1_21 = arith.constant 1 : index
    %c1_22 = arith.constant 1 : index
    %c0_23 = arith.constant 0 : index
    %c0_24 = arith.constant 0 : index
    %29 = vector.load %arg3[%c1_21, %c1_22, %c0_23, %c0_24] : memref<3x3x4x128xbf16, #tpu.memory_space<vmem>>, vector<1x1x4x128xbf16>
    %30 = vector.shape_cast %29 : vector<1x1x4x128xbf16> to vector<4x128xbf16>
    %cst_25 = arith.constant dense<0.000000e+00> : vector<256x128xf32>
    %31 = tpu.matmul %28, %30, %cst_25 {dimension_numbers = #tpu.dot_dimension_numbers<[1], [0], [0], [1], [0, 0, 1, 1], [], []>} : vector<256x4xbf16>, vector<4x128xbf16>, vector<256x128xf32> -> vector<256x128xf32>
    %32 = arith.addf %26, %31 : vector<256x128xf32>
    %33 = vector.extract_strided_slice %1 {offsets = [1, 2, 0], sizes = [16, 16, 4], strides = [1, 1, 1]} : vector<18x18x4xbf16> to vector<16x16x4xbf16>
    %34 = vector.shape_cast %33 : vector<16x16x4xbf16> to vector<256x4xbf16>
    %c1_26 = arith.constant 1 : index
    %c2_27 = arith.constant 2 : index
    %c0_28 = arith.constant 0 : index
    %c0_29 = arith.constant 0 : index
    %35 = vector.load %arg3[%c1_26, %c2_27, %c0_28, %c0_29] : memref<3x3x4x128xbf16, #tpu.memory_space<vmem>>, vector<1x1x4x128xbf16>
    %36 = vector.shape_cast %35 : vector<1x1x4x128xbf16> to vector<4x128xbf16>
    %cst_30 = arith.constant dense<0.000000e+00> : vector<256x128xf32>
    %37 = tpu.matmul %34, %36, %cst_30 {dimension_numbers = #tpu.dot_dimension_numbers<[1], [0], [0], [1], [0, 0, 1, 1], [], []>} : vector<256x4xbf16>, vector<4x128xbf16>, vector<256x128xf32> -> vector<256x128xf32>
    %38 = arith.addf %32, %37 : vector<256x128xf32>
    %39 = vector.extract_strided_slice %1 {offsets = [2, 0, 0], sizes = [16, 16, 4], strides = [1, 1, 1]} : vector<18x18x4xbf16> to vector<16x16x4xbf16>
    %40 = vector.shape_cast %39 : vector<16x16x4xbf16> to vector<256x4xbf16>
    %c2_31 = arith.constant 2 : index
    %c0_32 = arith.constant 0 : index
    %c0_33 = arith.constant 0 : index
    %c0_34 = arith.constant 0 : index
    %41 = vector.load %arg3[%c2_31, %c0_32, %c0_33, %c0_34] : memref<3x3x4x128xbf16, #tpu.memory_space<vmem>>, vector<1x1x4x128xbf16>
    %42 = vector.shape_cast %41 : vector<1x1x4x128xbf16> to vector<4x128xbf16>
    %cst_35 = arith.constant dense<0.000000e+00> : vector<256x128xf32>
    %43 = tpu.matmul %40, %42, %cst_35 {dimension_numbers = #tpu.dot_dimension_numbers<[1], [0], [0], [1], [0, 0, 1, 1], [], []>} : vector<256x4xbf16>, vector<4x128xbf16>, vector<256x128xf32> -> vector<256x128xf32>
    %44 = arith.addf %38, %43 : vector<256x128xf32>
    %45 = vector.extract_strided_slice %1 {offsets = [2, 1, 0], sizes = [16, 16, 4], strides = [1, 1, 1]} : vector<18x18x4xbf16> to vector<16x16x4xbf16>
    %46 = vector.shape_cast %45 : vector<16x16x4xbf16> to vector<256x4xbf16>
    %c2_36 = arith.constant 2 : index
    %c1_37 = arith.constant 1 : index
    %c0_38 = arith.constant 0 : index
    %c0_39 = arith.constant 0 : index
    %47 = vector.load %arg3[%c2_36, %c1_37, %c0_38, %c0_39] : memref<3x3x4x128xbf16, #tpu.memory_space<vmem>>, vector<1x1x4x128xbf16>
    %48 = vector.shape_cast %47 : vector<1x1x4x128xbf16> to vector<4x128xbf16>
    %cst_40 = arith.constant dense<0.000000e+00> : vector<256x128xf32>
    %49 = tpu.matmul %46, %48, %cst_40 {dimension_numbers = #tpu.dot_dimension_numbers<[1], [0], [0], [1], [0, 0, 1, 1], [], []>} : vector<256x4xbf16>, vector<4x128xbf16>, vector<256x128xf32> -> vector<256x128xf32>
    %50 = arith.addf %44, %49 : vector<256x128xf32>
    %51 = vector.extract_strided_slice %1 {offsets = [2, 2, 0], sizes = [16, 16, 4], strides = [1, 1, 1]} : vector<18x18x4xbf16> to vector<16x16x4xbf16>
    %52 = vector.shape_cast %51 : vector<16x16x4xbf16> to vector<256x4xbf16>
    %c2_41 = arith.constant 2 : index
    %c2_42 = arith.constant 2 : index
    %c0_43 = arith.constant 0 : index
    %c0_44 = arith.constant 0 : index
    %53 = vector.load %arg3[%c2_41, %c2_42, %c0_43, %c0_44] : memref<3x3x4x128xbf16, #tpu.memory_space<vmem>>, vector<1x1x4x128xbf16>
    %54 = vector.shape_cast %53 : vector<1x1x4x128xbf16> to vector<4x128xbf16>
    %cst_45 = arith.constant dense<0.000000e+00> : vector<256x128xf32>
    %55 = tpu.matmul %52, %54, %cst_45 {dimension_numbers = #tpu.dot_dimension_numbers<[1], [0], [0], [1], [0, 0, 1, 1], [], []>} : vector<256x4xbf16>, vector<4x128xbf16>, vector<256x128xf32> -> vector<256x128xf32>
    %56 = arith.addf %50, %55 : vector<256x128xf32>
    %c0_46 = arith.constant 0 : index
    %c0_47 = arith.constant 0 : index
    %57 = vector.load %arg4[%c0_46, %c0_47] : memref<1x128xf32, #tpu.memory_space<vmem>>, vector<1x128xf32>
    %58 = vector.broadcast %57 : vector<1x128xf32> to vector<256x128xf32>
    %59 = arith.addf %56, %58 : vector<256x128xf32>
    %cst_48 = arith.constant 0.000000e+00 : f32
    %60 = vector.broadcast %cst_48 : f32 to vector<256x128xf32>
    %61 = arith.maximumf %59, %60 : vector<256x128xf32>
    %c0_49 = arith.constant 0 : index
    %c0_50 = arith.constant 0 : index
    %c0_51 = arith.constant 0 : index
    %62 = vector.load %arg5[%c0_49, %c0_50, %c0_51] : memref<1x256x128xf32, #tpu.memory_space<vmem>>, vector<1x256x128xf32>
    %63 = vector.shape_cast %62 : vector<1x256x128xf32> to vector<256x128xf32>
    %64 = vector.shape_cast %61 : vector<256x128xf32> to vector<1x256x128xf32>
    tpu.vector_store %arg5[%c0_49, %c0_50, %c0_51], %64 {strides = array<i32>} : memref<1x256x128xf32, #tpu.memory_space<vmem>>, vector<1x256x128xf32>,
    return
  }
  func.func @transform_0(%arg0: i32, %arg1: i32) -> (i32, i32, i32, i32) {
    %c0_i32 = arith.constant 0 : i32
    %c0_i32_0 = arith.constant 0 : i32
    %c0_i32_1 = arith.constant 0 : i32
    %c0_i32_2 = arith.constant 0 : i32
    return %arg0, %c0_i32, %c0_i32_0, %c0_i32_1 : i32, i32, i32, i32
  }
  func.func @transform_1(%arg0: i32, %arg1: i32) -> (i32, i32, i32, i32) {
    %c0_i32 = arith.constant 0 : i32
    %c0_i32_0 = arith.constant 0 : i32
    %c0_i32_1 = arith.constant 0 : i32
    %c0_i32_2 = arith.constant 0 : i32
    return %c0_i32, %c0_i32_0, %c0_i32_1, %arg1 : i32, i32, i32, i32
  }
  func.func @transform_2(%arg0: i32, %arg1: i32) -> (i32, i32) {
    %c0_i32 = arith.constant 0 : i32
    %c0_i32_0 = arith.constant 0 : i32
    return %c0_i32, %arg1 : i32, i32
  }
  func.func @transform_3(%arg0: i32, %arg1: i32) -> (i32, i32, i32) {
    %c0_i32 = arith.constant 0 : i32
    %c0_i32_0 = arith.constant 0 : i32
    return %arg0, %c0_i32, %arg1 : i32, i32, i32
  }
}

</mosaic_0001>

<bundles_post_ra>
// kernel: tpu_custom_call.1
= control target key start
LH: loop header
LB: loop body
LE: loop exit
PB: predicated region body
PF: predicated region fallthrough
CT: control target
= control target key end

     0   :  { %8 = vsyncpa [#allocation3], 0  ;;  %s5641_s0 = inlined_call_operand.vmem [shape: bf16[2,18,18,4], index: 0, kind: input, shape index: {}]   ;;  %s5642_s1 = inlined_call_operand.vmem [shape: bf16[3,3,4,128], index: 1, kind: input, shape index: {}]   ;;  %s5643_s2 = inlined_call_operand.vmem [shape: f32[1,128], index: 2, kind: input, shape index: {}]   ;;  %s5644_s3 = inlined_call_operand.hbm [shape: f32[2,256,128], index: 3, kind: output, shape index: {}]  }
   0x1   :  { %10 = vsyncpa [#allocation3 + $0x1], 0  ;;  %s4035_s12 = smov 0   ;;  %s4037_s13 = smov 0  }
   0x2   :  { %s4039_s14 = smov 0   ;;  %s4041_s15 = smov 0  }
   0x3   :  { %s4043_s16 = smov 0   ;;  %s4045_s17 = smov 0  }
   0x4 LB: > { %s3147_s18 = sadd.s32 4294967295, %s4010_s17   ;;  %s3148_s19 = sadd.s32 4294967294, %s4010_s17   ;;  %s4010_s17 = sphi %s4045_s17, %s16_s17   ;;  %s4006_s16 = sphi %s4043_s16, %s5853_s16   ;;  %s4002_s15 = sphi %s4041_s15, %s5852_s15   ;;  %s3998_s14 = sphi %s4039_s14, %s5851_s14   ;;  %s3994_s13 = sphi %s4037_s13, %s5850_s13   ;;  %s3990_s12 = sphi %s4035_s12, %s5849_s12  }
   0x5   : > { %s28_s20 = sadd.s32 1, %s4006_s16  ;;  %s115_s21 = sadd.s32 1, %s3998_s14 }
   0x6   : > { %p30_p0 = scmp.ge.s32.totalorder %s28_s20, 2  ;;  %p125_p1 = scmp.ne.s32.totalorder %s3998_s14, %s3994_s13 }
   0x7   : > { %p126_p2 = scmp.eq.s32.totalorder %s3147_s18, 1  ;;  %p131_p3 = scmp.ne.s32.totalorder %s3994_s13, %s3990_s12 }
   0x8   : > { %s5855_s20 = smov (%p30_p0, %s28_s20), 0  ;;  %p132_p5 = scmp.eq.s32.totalorder %s3148_s19, 1 }
   0x9   : > { %p4075_p4 = por %p126_p2, %p125_p1  ;;  %s110_s23 = ssub.s32 %s4006_s16, %s5855_s20 }
   0xa   : > { %p3153_p6 = scmp.ge.s32.totalorder %s4010_s17, 1  ;;  %p113_p7 = scmp.eq.s32.totalorder %s110_s23, 0 }
   0xb   : > { %p4082_p8 = por %p132_p5, %p131_p3  ;;  %p171_p9 = scmp.lt.s32.totalorder %s4010_s17, 3 }
   0xc   : > { %s4088_s25 = scalar_select %p113_p7, %s3998_s14, %s115_s21  }
   0xd   : > { %p172_p10 = pnand %p3153_p6, %p171_p9 }
   0xf   : > { %175 = sbr.rel (%p172_p10) target bundleno = 579 (0x243), region = 32 }
  0x14   : > { %v3156_v0 = vld [vmem:[%s5642_s1 + $0x2] sm:$0x3]  ;;  %vm756_vm0 = vcmask 1041408   ;;  %p202_p11 = scmp.lt.s32.totalorder %s4002_s15, 1  ;;  %v269_v2 = vld [vmem:[%s5642_s1] sm:$0x3] }
  0x15   : > { %3849 = vmatprep.subr.msk.bf16.mxu1 %vm756_vm0, %v3156_v0  ;;  %3848 = vmatprep.subr.msk.bf16.mxu0 %vm756_vm0, %v3156_v0  ;;  %v758_v1 = vsel %vm756_vm0, %v3156_v0, 0  ;;  %v3237_v3 = vld [vmem:[%s5642_s1 + $0x4] sm:$0x3]  ;;  %vm270_vm1 = vsmask.f32 3328  ;;  %v4112_v4 = vsel %vm756_vm0, %v269_v2, 0 }
  0x16   : > { %3847 = vmatpush3.bf16.msra.mxu1 %v758_v1  ;;  %3541 = vmatpush3.bf16.msra.mxu0 %v758_v1  ;;  %s203_s30 = scalar_select %p202_p11, %s4002_s15, 1  ;;  %vm271_vm2 = vsmask.f32 7440  ;;  %v4115_v5 = vsel %vm756_vm0, %v3237_v3, 0  ;;  %vm707_vm3 = vcmask 31744   ;;  %v5690_v32 = vmov 0 }
  0x17   : > { %3850 = vmatprep.subr.msk.bf16.mxu1 %vm756_vm0, %v269_v2  ;;  %3851 = vmatprep.subr.msk.bf16.mxu0 %vm756_vm0, %v3237_v3  ;;  %vm4154_vm4 = vmor %vm270_vm1, %vm271_vm2  ;;  %vm1229_vm5 = vcmask 1042432   ;;  %vm1230_vm6 = vcmask 1046532   ;;  %s199_s5 = sand.u32 1, %s3994_s13   ;;  %s3386_s10 = sshll.u32 %s4002_s15, 12 }
  0x18   : > { %s3858_s6 = smul.u32 216, %s203_s30  ;;  %v5691_v32 = vsel %vm4154_vm4, 4294967295, %v5690_v32  ;;  %vm4477_vm7 = vmor %vm1229_vm5, %vm1230_vm6  ;;  %s3154_s8 = sshll.u32 %s199_s5, 8 }
  0x19   : > { %5692 = vst [vmem:[#allocation5_spill] sm:$0xff] %v5691_v32  ;;  %s5588_s21 = scalar_lea.hbm %s5644_s3, %s3386_s10  ;;  %s5596_s15 = scalar_lea.sflag [#allocation3], %s199_s5 }
  0x1a   : > { %s4109_s9 = scalar_lea.vmem %s5641_s0, %s3858_s6  ;;  %s4012_s26 = smov [#allocation2]  }
  0x1b   : > { %v4118_v6 = vld [vmem:[%s4109_s9] sm:$0xf]  ;;  %v4121_v7 = vld [vmem:[%s4109_s9 + $0x4] sm:$0xf]  ;;  %v4124_v8 = vld [vmem:[%s4109_s9 + $0x8] sm:$0x1] }
  0x1c   : > { %v274_v9 = vshrl.u32 %v4118_v6, 16  ;;  %v277_v10 = vshll.u32 %v4118_v6, 16  ;;  %v283_v11 = vshll.u32 %v4121_v7, 16  ;;  %v287_v12 = vshrl.u32 %v4121_v7, 16  ;;  %v4131_v13 = vld [vmem:[%s4109_s9 + $0x60] sm:$0xf] }
  0x1d   : > { %v293_v14 = vshll.u32 %v4124_v8, 16  ;;  %v4136_v16 = vld [vmem:[%s4109_s9 + $0x64] sm:$0xf]  ;;  %v4139_v17 = vld [vmem:[%s4109_s9 + $0x68] sm:$0x1]  ;;  %v466_v23 = vshrl.u32 %v4131_v13, 16 }
  0x1e   : > { %v276_v18 = vrot.slane %v274_v9, 4  ;;  %v279_v19 = vrot.slane %v277_v10, 5  ;;  %v285_v20 = vrot.slane %v283_v11, 5  ;;  %v289_v21 = vrot.slane %v287_v12, 4  ;;  %v4147_v30 = vld [vmem:[%s4109_s9 + $0xc] sm:$0xf] }
  0x1f   : > { %v295_v22 = vrot.slane %v293_v14, 5  ;;  %v469_v24 = vshll.u32 %v4131_v13, 16  ;;  %v475_v25 = vshll.u32 %v4136_v16, 16  ;;  %v479_v28 = vshrl.u32 %v4136_v16, 16  ;;  %v4150_v31 = vld [vmem:[%s4109_s9 + $0x10] sm:$0xf] }
  0x20   : > { %v280_v26 = vor.u32 %v279_v19, %v276_v18  ;;  %v290_v27 = vor.u32 %v289_v21, %v285_v20  ;;  %v485_v29 = vshll.u32 %v4139_v17, 16  ;;  %v468_v33 = vrot.slane %v466_v23, 4  ;;  %v4161_v42 = vld [vmem:[%s4109_s9 + $0x14] sm:$0x1]  ;;  %v4172_v54 = vld [vmem:[%s4109_s9 + $0x6c] sm:$0xf] }
  0x21   : > { %v471_v34 = vrot.slane %v469_v24, 5  ;;  %v477_v35 = vrot.slane %v475_v25, 5  ;;  %v481_v39 = vrot.slane %v479_v28, 4  ;;  %v298_v43 = vshrl.u32 %v4147_v30, 16  ;;  %5693 = vst [vmem:[#allocation6_spill] sm:$0xff] %v4172_v54  ;;  %s3938_s27 = sshll.u32 %s4012_s26, 4  ;;  %s3939_s27 = int_to_ptr.vmem [resolvable:$false] %s3938_s27 }
  0x22   : > { %v281_v37 = vrot.slane %v280_v26, 4  ;;  %v291_v38 = vrot.slane %v290_v27, 4  ;;  %v487_v40 = vrot.slane %v485_v29, 5  ;;  %v301_v44 = vshll.u32 %v4147_v30, 16  ;;  %v4176_v59 = vld [vmem:[%s4109_s9 + $0x70] sm:$0xf] }
  0x23   : > { %v472_v41 = vor.u32 %v471_v34, %v468_v33  ;;  %v307_v45 = vshll.u32 %v4150_v31, 16  ;;  %v482_v48 = vor.u32 %v481_v39, %v477_v35  ;;  %v311_v49 = vshrl.u32 %v4150_v31, 16  ;;  %v4184_v0 = vld [vmem:[%s4109_s9 + $0x74] sm:$0x1]  ;;  %v4190_v10 = vld [vmem:[%s4109_s9 + $0x18] sm:$0xf] }
  0x24   : > { %v286_v46 = vsel %vm4154_vm4, %v281_v37, %v285_v20  ;;  %v296_v47 = vsel %vm4154_vm4, %v291_v38, %v295_v22  ;;  %v300_v52 = vrot.slane %v298_v43, 4  ;;  %v303_v53 = vrot.slane %v301_v44, 5  ;;  %5694 = vst [vmem:[#allocation7_spill] sm:$0xff] %v4184_v0  ;;  %v4199_v23 = vld [vmem:[%s4109_s9 + $0x1c] sm:$0xf]  ;;  %s3940_s28 = scalar_lea.vmem %s3939_s27, 8192 }
  0x25   : > { %v3157_v50 = vcombine.low %v286_v46, %v296_v47  ;;  %v473_v51 = vrot.slane %v472_v41, 4  ;;  %v483_v55 = vrot.slane %v482_v48, 4  ;;  %v309_v56 = vrot.slane %v307_v45, 5  ;;  %v4206_v27 = vld [vmem:[%s4109_s9 + $0x20] sm:$0x1] }
  0x26   : > { %v313_v57 = vrot.slane %v311_v49, 4  ;;  %v317_v58 = vshll.u32 %v4161_v42, 16  ;;  %v304_v61 = vor.u32 %v303_v53, %v300_v52  ;;  %v490_v9 = vshrl.u32 %v4172_v54, 16  ;;  %v4213_v37 = vld [vmem:[%s4109_s9 + $0x78] sm:$0xf] }
  0x27   : > { %3542 = vmatprep.mubr.msk.bf16.mxu0 %vm707_vm3, %v3157_v50  ;;  %v478_v60 = vsel %vm4154_vm4, %v473_v51, %v477_v35  ;;  %v488_v1 = vsel %vm4154_vm4, %v483_v55, %v487_v40  ;;  %v493_v14 = vshll.u32 %v4172_v54, 16  ;;  %v499_v18 = vshll.u32 %v4176_v59, 16  ;;  %5696 = vst [vmem:[#allocation9_spill] sm:$0xff] %v4213_v37  ;;  %v4221_v43 = vld [vmem:[%s5642_s1 + $0x8] sm:$0x3] }
  0x28   : > { %v314_v2 = vor.u32 %v313_v57, %v309_v56  ;;  %v319_v3 = vrot.slane %v317_v58, 5  ;;  %v4192_v11 = vcombine.low %v478_v60, %v488_v1  ;;  %v305_v12 = vrot.slane %v304_v61, 4  ;;  %v4226_v48 = vld [vmem:[%s4109_s9 + $0x7c] sm:$0xf]  ;;  %v4234_v58 = vld [vmem:[%s4109_s9 + $0x80] sm:$0x1] }
  0x29   : > { %v492_v20 = vrot.slane %v490_v9, 4  ;;  %v503_v21 = vshrl.u32 %v4176_v59, 16  ;;  %v509_v22 = vshll.u32 %v4184_v0, 16  ;;  %v495_v25 = vrot.slane %v493_v14, 5  ;;  %5698 = vst [vmem:[#allocation11_spill] sm:$0xff] %v4226_v48  ;;  %5699 = vst [vmem:[#allocation12_spill] sm:$0xff] %v4234_v58 }
  0x2a   : > { %5695 = vst [vmem:[#allocation8_spill] sm:$0xff] %v4192_v11  ;;  %v315_v19 = vrot.slane %v314_v2, 4  ;;  %3558 = vmatprep.mubr.msk.bf16.mxu1 %vm707_vm3, %v4192_v11  ;;  %v310_v24 = vsel %vm4154_vm4, %v305_v12, %v309_v56  ;;  %v501_v26 = vrot.slane %v499_v18, 5  ;;  %v322_v28 = vshrl.u32 %v4190_v10, 16  ;;  %v4248_v18 = vld [vmem:[%s4109_s9 + $0x28] sm:$0xf] }
  0x2b   : > { %v505_v33 = vrot.slane %v503_v21, 4  ;;  %v511_v34 = vrot.slane %v509_v22, 5  ;;  %v325_v35 = vshll.u32 %v4190_v10, 16  ;;  %v496_v39 = vor.u32 %v495_v25, %v492_v20 }
  0x2c   : > { %v320_v29 = vsel %vm4154_vm4, %v315_v19, %v319_v3  ;;  %v324_v40 = vrot.slane %v322_v28, 4  ;;  %v331_v41 = vshll.u32 %v4199_v23, 16  ;;  %v335_v46 = vshrl.u32 %v4199_v23, 16  ;;  %v4240_v3 = vld [vmem:[%s4109_s9 + $0x24] sm:$0xf] }
  0x2d   : > { %v4215_v38 = vcombine.low %v310_v24, %v320_v29  ;;  %v506_v44 = vor.u32 %v505_v33, %v501_v26  ;;  %v327_v45 = vrot.slane %v325_v35, 5  ;;  %v341_v47 = vshll.u32 %v4206_v27, 16  ;;  %v4256_v24 = vld [vmem:[%s5642_s1 + $0x6] sm:$0x3]  ;;  %v4261_v29 = vld [vmem:[%s4109_s9 + $0x2c] sm:$0x1] }
  0x2e   : > { %v497_v49 = vrot.slane %v496_v39, 4  ;;  %v333_v50 = vrot.slane %v331_v41, 5  ;;  %v514_v51 = vshrl.u32 %v4213_v37, 16  ;;  %v517_v52 = vshll.u32 %v4213_v37, 16  ;;  %v4269_v41 = vld [vmem:[%s4109_s9 + $0x84] sm:$0xf] }
  0x2f   : > { %5697 = vst [vmem:[#allocation10_spill] sm:$0xff] %v4215_v38  ;;  %3543 = vmatmul.mubr.msk.bf16.vlgmr.msra.gmra.mxu0 %vm707_vm3, %v4215_v38  ;;  %v507_v53 = vrot.slane %v506_v44, 4  ;;  %v328_v55 = vor.u32 %v327_v45, %v324_v40  ;;  %v337_v56 = vrot.slane %v335_v46, 4  ;;  %v343_v57 = vrot.slane %v341_v47, 5  ;;  %v4416_v38 = vld [vmem:[%s4109_s9 + $0xb0] sm:$0x1] }
  0x30   : > { %3609 = vmatpush3.bf16.msra.mxu0 %v4115_v5  ;;  %v502_v60 = vsel %vm4154_vm4, %v497_v49, %v501_v26  ;;  %v516_v61 = vrot.slane %v514_v51, 4  ;;  %v519_v1 = vrot.slane %v517_v52, 5  ;;  %v523_v2 = vshll.u32 %v4226_v48, 16  ;;  %v4276_v49 = vld [vmem:[%s4109_s9 + $0x88] sm:$0xf]  ;;  %5711 = vst [vmem:[#allocation24_spill] sm:$0xff] %v4416_v38 }
  0x31   : > { %3853 = vmatprep.subr.msk.bf16.mxu0 %vm756_vm0, %v4221_v43  ;;  %v512_v5 = vsel %vm4154_vm4, %v507_v53, %v511_v34  ;;  %v329_v9 = vrot.slane %v328_v55, 4  ;;  %v338_v12 = vor.u32 %v337_v56, %v333_v50  ;;  %v527_v14 = vshrl.u32 %v4226_v48, 16  ;;  %v4438_v48 = vld [vmem:[%s4109_s9 + $0x5c] sm:$0x1] }
  0x32   : > { %v4250_v19 = vcombine.low %v502_v60, %v512_v5  ;;  %v520_v20 = vor.u32 %v519_v1, %v516_v61  ;;  %v525_v21 = vrot.slane %v523_v2, 5  ;;  %v533_v22 = vshll.u32 %v4234_v58, 16 }
  0x33   : > { %v334_v25 = vsel %vm4154_vm4, %v329_v9, %v333_v50  ;;  %v339_v26 = vrot.slane %v338_v12, 4  ;;  %v529_v28 = vrot.slane %v527_v14, 4  ;;  %v346_v33 = vshrl.u32 %v4240_v3, 16  ;;  %v4295_v9 = vld [vmem:[%s4109_s9 + $0x30] sm:$0xf] }
  0x34   : > { %5700 = vst [vmem:[#allocation13_spill] sm:$0xff] %v4250_v19  ;;  %3559 = vmatmul.mubr.msk.bf16.vlgmr.msra.gmra.mxu1 %vm707_vm3, %v4250_v19  ;;  %v521_v34 = vrot.slane %v520_v20, 4  ;;  %v535_v35 = vrot.slane %v533_v22, 5  ;;  %v349_v39 = vshll.u32 %v4240_v3, 16  ;;  %v355_v40 = vshll.u32 %v4248_v18, 16 }
  0x35   : > { %3575 = vmatpush3.bf16.msra.mxu1 %v4112_v4  ;;  %v344_v44 = vsel %vm4154_vm4, %v339_v26, %v343_v57  ;;  %v530_v45 = vor.u32 %v529_v28, %v525_v21  ;;  %v348_v46 = vrot.slane %v346_v33, 4  ;;  %v359_v47 = vshrl.u32 %v4248_v18, 16  ;;  %v4286_v57 = vld [vmem:[%s4109_s9 + $0x8c] sm:$0x1]  ;;  %v4300_v22 = vld [vmem:[%s4109_s9 + $0x34] sm:$0xf] }
  0x36   : > { %v4278_v50 = vcombine.low %v334_v25, %v344_v44  ;;  %v526_v51 = vsel %vm4154_vm4, %v521_v34, %v525_v21  ;;  %v351_v52 = vrot.slane %v349_v39, 5  ;;  %v357_v53 = vrot.slane %v355_v40, 5  ;;  %3852 = vmatprep.subr.msk.bf16.mxu1 %vm756_vm0, %v4256_v24 }
  0x37   : > { %v531_v4 = vrot.slane %v530_v45, 4  ;;  %v361_v55 = vrot.slane %v359_v47, 4  ;;  %v365_v56 = vshll.u32 %v4261_v29, 16  ;;  %v538_v60 = vshrl.u32 %v4269_v41, 16 }
  0x38   : > { %5701 = vst [vmem:[#allocation14_spill] sm:$0xff] %v4278_v50  ;;  %3546 = vmatprep.mubr.msk.bf16.mxu0 %vm707_vm3, %v4278_v50  ;;  %v352_v61 = vor.u32 %v351_v52, %v348_v46  ;;  %v541_v1 = vshll.u32 %v4269_v41, 16  ;;  %v547_v2 = vshll.u32 %v4276_v49, 16  ;;  %v551_v5 = vshrl.u32 %v4276_v49, 16  ;;  %v4311_v46 = vld [vmem:[%s4109_s9 + $0x38] sm:$0x1] }
  0x39   : > { %v536_v12 = vsel %vm4154_vm4, %v531_v4, %v535_v35  ;;  %v362_v14 = vor.u32 %v361_v55, %v357_v53  ;;  %v367_v20 = vrot.slane %v365_v56, 5  ;;  %v540_v21 = vrot.slane %v538_v60, 4  ;;  %v4316_v52 = vld [vmem:[%s4109_s9 + $0x90] sm:$0xf] }
  0x3a   : > { %v4302_v25 = vcombine.low %v526_v51, %v536_v12  ;;  %v353_v26 = vrot.slane %v352_v61, 4  ;;  %v543_v28 = vrot.slane %v541_v1, 5  ;;  %v549_v33 = vrot.slane %v547_v2, 5  ;;  %v4321_v61 = vld [vmem:[%s4109_s9 + $0x94] sm:$0xf] }
  0x3b   : > { %v363_v34 = vrot.slane %v362_v14, 4  ;;  %v553_v39 = vrot.slane %v551_v5, 4  ;;  %v557_v40 = vshll.u32 %v4286_v57, 16  ;;  %v370_v44 = vshrl.u32 %v4295_v9, 16 }
  0x3c   : > { %5702 = vst [vmem:[#allocation15_spill] sm:$0xff] %v4302_v25  ;;  %3562 = vmatprep.mubr.msk.bf16.mxu1 %vm707_vm3, %v4302_v25  ;;  %v358_v35 = vsel %vm4154_vm4, %v353_v26, %v357_v53  ;;  %v544_v45 = vor.u32 %v543_v28, %v540_v21  ;;  %v373_v47 = vshll.u32 %v4295_v9, 16  ;;  %v379_v51 = vshll.u32 %v4300_v22, 16  ;;  %v4367_v25 = vld [vmem:[%s4109_s9 + $0xa0] sm:$0xf] }
  0x3d   : > { %v368_v4 = vsel %vm4154_vm4, %v363_v34, %v367_v20  ;;  %v554_v55 = vor.u32 %v553_v39, %v549_v33  ;;  %v559_v56 = vrot.slane %v557_v40, 5  ;;  %v372_v60 = vrot.slane %v370_v44, 4  ;;  %v4333_v34 = vld [vmem:[%s4109_s9 + $0x98] sm:$0x1]  ;;  %v4338_v44 = vld [vmem:[%s4109_s9 + $0x3c] sm:$0xf] }
  0x3e   : > { %v4323_v53 = vcombine.low %v358_v35, %v368_v4  ;;  %v545_v1 = vrot.slane %v544_v45, 4  ;;  %v375_v2 = vrot.slane %v373_v47, 5  ;;  %v381_v5 = vrot.slane %v379_v51, 5  ;;  %v4343_v4 = vld [vmem:[%s4109_s9 + $0x40] sm:$0xf] }
  0x3f   : > { %v555_v12 = vrot.slane %v554_v55, 4  ;;  %v383_v14 = vshrl.u32 %v4300_v22, 16  ;;  %v389_v21 = vshll.u32 %v4311_v46, 16  ;;  %v562_v20 = vshrl.u32 %v4316_v52, 16 }
  0x40   : > { %5703 = vst [vmem:[#allocation16_spill] sm:$0xff] %v4323_v53  ;;  %3547 = vmatmul.mubr.msk.bf16.gmra.mxu0 %vm707_vm3, %v4323_v53  ;;  %v550_v26 = vsel %vm4154_vm4, %v545_v1, %v549_v33  ;;  %v376_v28 = vor.u32 %v375_v2, %v372_v60  ;;  %v565_v39 = vshll.u32 %v4316_v52, 16  ;;  %v571_v40 = vshll.u32 %v4321_v61, 16 }
  0x41   : > { %v560_v35 = vsel %vm4154_vm4, %v555_v12, %v559_v56  ;;  %v385_v45 = vrot.slane %v383_v14, 4  ;;  %v391_v47 = vrot.slane %v389_v21, 5  ;;  %v564_v51 = vrot.slane %v562_v20, 4  ;;  %v4355_v14 = vld [vmem:[%s4109_s9 + $0x44] sm:$0x1] }
  0x42   : > { %v4345_v33 = vcombine.low %v550_v26, %v560_v35  ;;  %v377_v55 = vrot.slane %v376_v28, 4  ;;  %v567_v60 = vrot.slane %v565_v39, 5  ;;  %v573_v1 = vrot.slane %v571_v40, 5  ;;  %v4360_v26 = vld [vmem:[%s4109_s9 + $0x9c] sm:$0xf] }
  0x43   : > { %v386_v2 = vor.u32 %v385_v45, %v381_v5  ;;  %v575_v36 = vshrl.u32 %v4321_v61, 16  ;;  %v581_v63 = vshll.u32 %v4333_v34, 16  ;;  %v394_v15 = vshrl.u32 %v4338_v44, 16 }
  0x44   : > { %5704 = vst [vmem:[#allocation17_spill] sm:$0xff] %v4345_v33  ;;  %3563 = vmatmul.mubr.msk.bf16.gmra.mxu1 %vm707_vm3, %v4345_v33  ;;  %v382_v56 = vsel %vm4154_vm4, %v377_v55, %v381_v5  ;;  %v568_v12 = vor.u32 %v567_v60, %v564_v51  ;;  %v397_v21 = vshll.u32 %v4338_v44, 16  ;;  %v403_v20 = vshll.u32 %v4343_v4, 16 }
  0x45   : > { %v387_v28 = vrot.slane %v386_v2, 4  ;;  %v577_v39 = vrot.slane %v575_v36, 4  ;;  %v583_v40 = vrot.slane %v581_v63, 5  ;;  %v396_v35 = vrot.slane %v394_v15, 4 }
  0x46   : > { %v569_v45 = vrot.slane %v568_v12, 4  ;;  %v399_v62 = vrot.slane %v397_v21, 5  ;;  %v405_v33 = vrot.slane %v403_v20, 5  ;;  %v407_v5 = vshrl.u32 %v4343_v4, 16  ;;  %v4375_v21 = vld [vmem:[%s4109_s9 + $0xa4] sm:$0x1] }
  0x47   : > { %v392_v51 = vsel %vm4154_vm4, %v387_v28, %v391_v47  ;;  %v578_v55 = vor.u32 %v577_v39, %v573_v1  ;;  %v413_v60 = vshll.u32 %v4355_v14, 16  ;;  %v586_v2 = vshrl.u32 %v4360_v26, 16  ;;  %5706 = vst [vmem:[#allocation19_spill] sm:$0xff] %v4375_v21  ;;  %v4378_v20 = vld [vmem:[%s4109_s9 + $0x48] sm:$0xf] }
  0x48   : > { %v4370_v36 = vcombine.low %v382_v56, %v392_v51  ;;  %v574_v15 = vsel %vm4154_vm4, %v569_v45, %v573_v1  ;;  %v400_v63 = vor.u32 %v399_v62, %v396_v35  ;;  %v409_v12 = vrot.slane %v407_v5, 4 }
  0x49   : > { %v579_v47 = vrot.slane %v578_v55, 4  ;;  %v415_v28 = vrot.slane %v413_v60, 5  ;;  %v588_v39 = vrot.slane %v586_v2, 4  ;;  %v589_v19 = vshll.u32 %v4360_v26, 16  ;;  %v4389_v55 = vld [vmem:[%s4109_s9 + $0x4c] sm:$0xf] }
  0x4a   : > { %5705 = vst [vmem:[#allocation18_spill] sm:$0xff] %v4370_v36  ;;  %3550 = vmatprep.mubr.msk.bf16.mxu0 %vm707_vm3, %v4370_v36  ;;  %v401_v56 = vrot.slane %v400_v63, 4  ;;  %v410_v51 = vor.u32 %v409_v12, %v405_v33  ;;  %v595_v1 = vshll.u32 %v4367_v25, 16  ;;  %v599_v62 = vshrl.u32 %v4367_v25, 16  ;;  %v4397_v36 = vld [vmem:[%s4109_s9 + $0x50] sm:$0x1] }
  0x4b   : > { %v584_v35 = vsel %vm4154_vm4, %v579_v47, %v583_v40  ;;  %v591_v45 = vrot.slane %v589_v19, 5  ;;  %v605_v5 = vshll.u32 %v4375_v21, 16  ;;  %v418_v60 = vshrl.u32 %v4378_v20, 16  ;;  %v4400_v47 = vld [vmem:[%s4109_s9 + $0xa8] sm:$0xf] }
  0x4c   : > { %v4392_v2 = vcombine.low %v574_v15, %v584_v35  ;;  %v406_v63 = vsel %vm4154_vm4, %v401_v56, %v405_v33  ;;  %v411_v12 = vrot.slane %v410_v51, 4  ;;  %v597_v11 = vrot.slane %v595_v1, 5  ;;  %5708 = vst [vmem:[#allocation21_spill] sm:$0xff] %v4400_v47 }
  0x4d   : > { %v592_v53 = vor.u32 %v591_v45, %v588_v39  ;;  %v601_v50 = vrot.slane %v599_v62, 4  ;;  %v607_v40 = vrot.slane %v605_v5, 5  ;;  %v420_v19 = vrot.slane %v418_v60, 4  ;;  %v4413_v45 = vld [vmem:[%s4109_s9 + $0xac] sm:$0xf] }
  0x4e   : > { %5707 = vst [vmem:[#allocation20_spill] sm:$0xff] %v4392_v2  ;;  %3566 = vmatprep.mubr.msk.bf16.mxu1 %vm707_vm3, %v4392_v2  ;;  %v416_v15 = vsel %vm4154_vm4, %v411_v12, %v415_v28  ;;  %v421_v33 = vshll.u32 %v4378_v20, 16  ;;  %v427_v56 = vshll.u32 %v4389_v55, 16  ;;  %v431_v51 = vshrl.u32 %v4389_v55, 16  ;;  %5710 = vst [vmem:[#allocation23_spill] sm:$0xff] %v4413_v45 }
  0x4f   : > { %v4409_v1 = vcombine.low %v406_v63, %v416_v15  ;;  %v593_v39 = vrot.slane %v592_v53, 4  ;;  %v602_v62 = vor.u32 %v601_v50, %v597_v11  ;;  %v437_v35 = vshll.u32 %v4397_v36, 16 }
  0x50   : > { %v423_v5 = vrot.slane %v421_v33, 5  ;;  %v429_v60 = vrot.slane %v427_v56, 5  ;;  %v433_v2 = vrot.slane %v431_v51, 4  ;;  %v610_v28 = vshrl.u32 %v4400_v47, 16  ;;  %v4426_v51 = vld [vmem:[%s4109_s9 + $0x54] sm:$0xf] }
  0x51   : > { %5709 = vst [vmem:[#allocation22_spill] sm:$0xff] %v4409_v1  ;;  %3551 = vmatmul.mubr.msk.bf16.gmra.mxu0 %vm707_vm3, %v4409_v1  ;;  %v598_v53 = vsel %vm4154_vm4, %v593_v39, %v597_v11  ;;  %v603_v50 = vrot.slane %v602_v62, 4  ;;  %v439_v63 = vrot.slane %v437_v35, 5  ;;  %v613_v12 = vshll.u32 %v4400_v47, 16  ;;  %v4433_v62 = vld [vmem:[%s4109_s9 + $0x58] sm:$0xf] }
  0x52   : > { %v424_v15 = vor.u32 %v423_v5, %v420_v19  ;;  %v434_v58 = vor.u32 %v433_v2, %v429_v60  ;;  %v612_v33 = vrot.slane %v610_v28, 4  ;;  %v619_v56 = vshll.u32 %v4413_v45, 16 }
  0x53   : > { %v608_v1 = vsel %vm4154_vm4, %v603_v50, %v607_v40  ;;  %v615_v37 = vrot.slane %v613_v12, 5  ;;  %v623_v11 = vshrl.u32 %v4413_v45, 16  ;;  %v629_v39 = vshll.u32 %v4416_v38, 16 }
  0x54   : > { %v4435_v2 = vcombine.low %v598_v53, %v608_v1  ;;  %v425_v19 = vrot.slane %v424_v15, 4  ;;  %v435_v35 = vrot.slane %v434_v58, 4  ;;  %v621_v5 = vrot.slane %v619_v56, 5 }
  0x55   : > { %v616_v28 = vor.u32 %v615_v37, %v612_v33  ;;  %v625_v0 = vrot.slane %v623_v11, 4  ;;  %v631_v54 = vrot.slane %v629_v39, 5  ;;  %v442_v40 = vshrl.u32 %v4426_v51, 16  ;;  %v4450_v37 = vld [vmem:[%s4109_s9 + $0xb4] sm:$0xf] }
  0x56   : > { %5712 = vst [vmem:[#allocation25_spill] sm:$0xff] %v4435_v2  ;;  %3567 = vmatmul.mubr.msk.bf16.gmra.mxu1 %vm707_vm3, %v4435_v2  ;;  %v430_v50 = vsel %vm4154_vm4, %v425_v19, %v429_v60  ;;  %v440_v1 = vsel %vm4154_vm4, %v435_v35, %v439_v63  ;;  %v445_v58 = vshll.u32 %v4426_v51, 16  ;;  %v451_v53 = vshll.u32 %v4433_v62, 16  ;;  %5713 = vst [vmem:[#allocation26_spill] sm:$0xff] %v4450_v37  ;;  %v4455_v11 = vld [vmem:[%s4109_s9 + $0xb8] sm:$0xf] }
  0x57   : > { %v4452_v12 = vcombine.low %v430_v50, %v440_v1  ;;  %v617_v15 = vrot.slane %v616_v28, 4  ;;  %v626_v33 = vor.u32 %v625_v0, %v621_v5  ;;  %v444_v56 = vrot.slane %v442_v40, 4 }
  0x58   : > { %v447_v39 = vrot.slane %v445_v58, 5  ;;  %v453_v2 = vrot.slane %v451_v53, 5  ;;  %v455_v60 = vshrl.u32 %v4433_v62, 16  ;;  %v461_v63 = vshll.u32 %v4438_v48, 16  ;;  %v4466_v58 = vld [vmem:[%s4109_s9 + $0xbc] sm:$0x1] }
  0x59   : > { %5714 = vst [vmem:[#allocation27_spill] sm:$0xff] %v4452_v12  ;;  %3554 = vmatprep.mubr.msk.bf16.mxu0 %vm707_vm3, %v4452_v12  ;;  %v622_v19 = vsel %vm4154_vm4, %v617_v15, %v621_v5  ;;  %v627_v35 = vrot.slane %v626_v33, 4  ;;  %v634_v28 = vshrl.u32 %v4450_v37, 16  ;;  %v637_v0 = vshll.u32 %v4450_v37, 16 }
  0x5a   : > { %v448_v40 = vor.u32 %v447_v39, %v444_v56  ;;  %v457_v50 = vrot.slane %v455_v60, 4  ;;  %v463_v1 = vrot.slane %v461_v63, 5  ;;  %v643_v53 = vshll.u32 %v4455_v11, 16 }
  0x5b   : > { %v632_v38 = vsel %vm4154_vm4, %v627_v35, %v631_v54  ;;  %v636_v47 = vrot.slane %v634_v28, 4  ;;  %v639_v12 = vrot.slane %v637_v0, 5  ;;  %v647_v45 = vshrl.u32 %v4455_v11, 16 }
  0x5c   : > { %v4472_v5 = vcombine.low %v622_v19, %v632_v38  ;;  %v449_v15 = vrot.slane %v448_v40, 4  ;;  %v458_v33 = vor.u32 %v457_v50, %v453_v2  ;;  %v645_v21 = vrot.slane %v643_v53, 5 }
  0x5d   : > { %v640_v37 = vor.u32 %v639_v12, %v636_v47  ;;  %v649_v56 = vrot.slane %v647_v45, 4  ;;  %v653_v39 = vshll.u32 %v4466_v58, 16  ;;  %v3221_v54 = vrot.slane %v4118_v6, 9 }
  0x5e   : > { %3570 = vmatprep.mubr.msk.bf16.mxu1 %vm707_vm3, %v4472_v5  ;;  %v454_v38 = vsel %vm4154_vm4, %v449_v15, %v453_v2  ;;  %v459_v63 = vrot.slane %v458_v33, 4  ;;  %v1234_v47 = vrot.slane %v4121_v7, 5  ;;  %v4489_v45 = vcombine.low %v4147_v30, %v4150_v31 }
  0x5f   : > { %v641_v12 = vrot.slane %v640_v37, 4  ;;  %v650_v19 = vor.u32 %v649_v56, %v645_v21  ;;  %v655_v35 = vrot.slane %v653_v39, 5  ;;  %v3222_v28 = vrot.slane %v4147_v30, 9 }
  0x60   : > { %v464_v0 = vsel %vm4154_vm4, %v459_v63, %v463_v1  ;;  %v1235_v40 = vsel %vm4477_vm7, %v3221_v54, %v1234_v47  ;;  %v1236_v50 = vrot.slane %v1234_v47, 4  ;;  %v5717_v2 = vrot.slane %v4150_v31, 5 }
  0x61   : > { %v4498_v15 = vcombine.low %v454_v38, %v464_v0  ;;  %v646_v33 = vsel %vm4154_vm4, %v641_v12, %v645_v21  ;;  %v651_v37 = vrot.slane %v650_v19, 4  ;;  %v5719_v1 = vrot.slane %v4124_v8, 5 }
  0x62   : > { %v1243_v53 = vrot.slane %v5717_v2, 4  ;;  %v5718_v56 = vmov %v5717_v2  ;;  %v5720_v54 = vrot.slane %v4161_v42, 5  ;;  %v4516_v63 = vcombine.low %v4190_v10, %v4199_v23 }
  0x63   : > { %v1242_v30 = vsel %vm4477_vm7, %v3222_v28, %v5718_v56  ;;  %v1238_v39 = vsel %vm4477_vm7, %v1236_v50, %v5719_v1  ;;  %v3223_v21 = vrot.slane %v4190_v10, 9  ;;  %3555 = vmatmul.mubr.msk.bf16.gmra.mxu0 %vm707_vm3, %v4498_v15  ;;  %v656_v8 = vsel %vm4154_vm4, %v651_v37, %v655_v35 }
  0x64   : > { %v1245_v38 = vsel %vm4477_vm7, %v1243_v53, %v5720_v54  ;;  %v3238_v31 = vcombine.low %v1235_v40, %v1238_v39  ;;  %v1248_v42 = vrot.slane %v4199_v23, 5  ;;  %v4526_v12 = vcombine.low %v646_v33, %v656_v8 }
  0x65   : > { %v4523_v47 = vcombine.low %v1242_v30, %v1245_v38  ;;  %v1251_v19 = vrot.slane %v4206_v27, 5  ;;  %v1255_v0 = vrot.slane %v4248_v18, 5  ;;  %v3224_v35 = vrot.slane %v4240_v3, 9 }
  0x66   : > { %5721 = vst [vmem:[#allocation28_spill] sm:$0xff] %v4526_v12  ;;  %3610 = vmatprep.mubr.msk.bf16.mxu0 %vm707_vm3, %v3238_v31  ;;  %v1249_v10 = vsel %vm4477_vm7, %v3223_v21, %v1248_v42  ;;  %v1250_v28 = vrot.slane %v1248_v42, 4  ;;  %3571 = vmatmul.mubr.msk.bf16.gmra.mxu1 %vm707_vm3, %v4526_v12  ;;  %v3225_v40 = vrot.slane %v4295_v9, 9  ;;  %v1262_v23 = vrot.slane %v4300_v22, 5 }
  0x67   : > { %v5722_v27 = vcombine.low %v4118_v6, %v4121_v7  ;;  %v1257_v2 = vrot.slane %v1255_v0, 4  ;;  %v1258_v53 = vrot.slane %v4261_v29, 5  ;;  %v1265_v33 = vrot.slane %v4311_v46, 5  ;;  %v4561_v46 = vld [vmem:[%s5642_s1 + $0xc] sm:$0x3] }
  0x68   : > { %v1252_v50 = vsel %vm4477_vm7, %v1250_v28, %v1251_v19  ;;  %v1264_v56 = vrot.slane %v1262_v23, 4  ;;  %v1877_v30 = vsel %vm756_vm0, %v4221_v43, 0  ;;  %v1269_v1 = vrot.slane %v4343_v4, 5  ;;  %v4578_v19 = vld [vmem:[%s5642_s1 + $0xa] sm:$0x3] }
  0x69   : > { %3576 = vmatprep.mubr.msk.bf16.mxu1 %vm707_vm3, %v5722_v27  ;;  %v4546_v37 = vcombine.low %v1249_v10, %v1252_v50  ;;  %v1649_v6 = vsel %vm756_vm0, %v4256_v24, 0  ;;  %v1256_v7 = vsel %vm4477_vm7, %v3224_v35, %v1255_v0  ;;  %v1263_v39 = vsel %vm4477_vm7, %v3225_v40, %v1262_v23 }
  0x6a   : > { %v1276_v29 = vrot.slane %v4389_v55, 5  ;;  %v1259_v43 = vsel %vm4477_vm7, %v1257_v2, %v1258_v53  ;;  %v1266_v24 = vsel %vm4477_vm7, %v1264_v56, %v1265_v33  ;;  %v3226_v54 = vrot.slane %v4338_v44, 9 }
  0x6b   : > { %3611 = vmatmul.mubr.msk.bf16.vlgmr.msra.gmra.mxu0 %vm707_vm3, %v4523_v47  ;;  %v1272_v38 = vrot.slane %v4355_v14, 5  ;;  %v1271_v21 = vrot.slane %v1269_v1, 4  ;;  %v3227_v8 = vrot.slane %v4378_v20, 9  ;;  %v1279_v42 = vrot.slane %v4397_v36, 5 }
  0x6c   : > { %3677 = vmatpush3.bf16.msra.mxu0 %v1877_v30  ;;  %3614 = vmatprep.mubr.msk.bf16.mxu0 %vm707_vm3, %v4546_v37  ;;  %v1278_v31 = vrot.slane %v1276_v29, 4  ;;  %v4586_v14 = vcombine.low %v1256_v7, %v1259_v43  ;;  %v4588_v10 = vcombine.low %v1263_v39, %v1266_v24  ;;  %v1270_v36 = vsel %vm4477_vm7, %v3226_v54, %v1269_v1 }
  0x6d   : > { %3855 = vmatprep.subr.msk.bf16.mxu0 %vm756_vm0, %v4561_v46  ;;  %v1273_v28 = vsel %vm4477_vm7, %v1271_v21, %v1272_v38  ;;  %v1277_v0 = vsel %vm4477_vm7, %v3227_v8, %v1276_v29  ;;  %v1283_v40 = vrot.slane %v4433_v62, 5  ;;  %v1293_v23 = vrot.slane %v4139_v17, 5  ;;  %v5723_v8 = vld [vmem:[#allocation19_spill] sm:$0xff] }
  0x6e   : > { %3577 = vmatmul.mubr.msk.bf16.vlgmr.msra.gmra.mxu1 %vm707_vm3, %v4489_v45  ;;  %v1280_v35 = vsel %vm4477_vm7, %v1278_v31, %v1279_v42  ;;  %v3228_v27 = vrot.slane %v4426_v51, 9  ;;  %v3229_v50 = vrot.slane %v4131_v13, 9  ;;  %v1290_v2 = vrot.slane %v4136_v16, 5  ;;  %v5724_v42 = vld [vmem:[#allocation23_spill] sm:$0xff] }
  0x6f   : > { %3643 = vmatpush3.bf16.msra.mxu1 %v1649_v6  ;;  %3580 = vmatprep.mubr.msk.bf16.mxu1 %vm707_vm3, %v4516_v63  ;;  %v4607_v53 = vcombine.low %v4240_v3, %v4248_v18  ;;  %v4611_v33 = vcombine.low %v4295_v9, %v4300_v22  ;;  %v4615_v56 = vcombine.low %v4338_v44, %v4343_v4  ;;  %v1286_v3 = vrot.slane %v4438_v48, 5 }
  0x70   : > { %3854 = vmatprep.subr.msk.bf16.mxu1 %vm756_vm0, %v4578_v19  ;;  %v4619_v17 = vcombine.low %v4378_v20, %v4389_v55  ;;  %v4623_v30 = vcombine.low %v1270_v36, %v1273_v28  ;;  %v4625_v1 = vcombine.low %v1277_v0, %v1280_v35  ;;  %v4630_v18 = vcombine.low %v4269_v41, %v4276_v49  ;;  %v5725_v36 = vld [vmem:[#allocation21_spill] sm:$0xff] }
  0x71   : > { %v1285_v9 = vrot.slane %v1283_v40, 4  ;;  %v3232_v22 = vrot.slane %v4269_v41, 9  ;;  %v1311_v44 = vrot.slane %v4276_v49, 5  ;;  %v1314_v4 = vrot.slane %v4286_v57, 5 }
  0x72   : > { %v1284_v20 = vsel %vm4477_vm7, %v3228_v27, %v1283_v40  ;;  %v1291_v48 = vsel %vm4477_vm7, %v3229_v50, %v1290_v2  ;;  %v1292_v55 = vrot.slane %v1290_v2, 4  ;;  %v4643_v6 = vcombine.low %v4316_v52, %v4321_v61  ;;  %v5726_v40 = vld [vmem:[#allocation24_spill] sm:$0xff] }
  0x73   : > { %3615 = vmatmul.mubr.msk.bf16.gmra.mxu0 %vm707_vm3, %v4586_v14  ;;  %v1312_v41 = vsel %vm4477_vm7, %v3232_v22, %v1311_v44  ;;  %v1313_v49 = vrot.slane %v1311_v44, 4  ;;  %v3233_v57 = vrot.slane %v4316_v52, 9  ;;  %v1318_v7 = vrot.slane %v4321_v61, 5 }
  0x74   : > { %3618 = vmatprep.mubr.msk.bf16.mxu0 %vm707_vm3, %v4588_v10  ;;  %v1297_v39 = vrot.slane %v4176_v59, 5  ;;  %v1321_v29 = vrot.slane %v4333_v34, 5  ;;  %v4657_v43 = vcombine.low %v4360_v26, %v4367_v25  ;;  %v3234_v24 = vrot.slane %v4360_v26, 9 }
  0x75   : > { %v1287_v54 = vsel %vm4477_vm7, %v1285_v9, %v1286_v3  ;;  %v1315_v52 = vsel %vm4477_vm7, %v1313_v49, %v1314_v4  ;;  %v1319_v61 = vsel %vm4477_vm7, %v3233_v57, %v1318_v7  ;;  %v1320_v38 = vrot.slane %v1318_v7, 4  ;;  %v5727_v3 = vld [vmem:[#allocation26_spill] sm:$0xff]  ;;  %v5728_v57 = vld [vmem:[#allocation11_spill] sm:$0xff] }
  0x76   : > { %3581 = vmatmul.mubr.msk.bf16.gmra.mxu1 %vm707_vm3, %v4607_v53  ;;  %v4666_v21 = vcombine.low %v1312_v41, %v1315_v52  ;;  %v1325_v34 = vrot.slane %v4367_v25, 5  ;;  %v1328_v31 = vrot.slane %v5723_v8, 5  ;;  %v4672_v28 = vcombine.low %v5725_v36, %v5724_v42 }
  0x77   : > { %3584 = vmatprep.mubr.msk.bf16.mxu1 %vm707_vm3, %v4611_v33  ;;  %v1322_v26 = vsel %vm4477_vm7, %v1320_v38, %v1321_v29  ;;  %v3235_v0 = vrot.slane %v5725_v36, 9  ;;  %v1332_v35 = vrot.slane %v5724_v42, 5  ;;  %v1335_v27 = vrot.slane %v5726_v40, 5  ;;  %v5730_v42 = vld [vmem:[#allocation7_spill] sm:$0xff] }
  0x78   : > { %v4681_v50 = vcombine.low %v1319_v61, %v1322_v26  ;;  %v1326_v25 = vsel %vm4477_vm7, %v3234_v24, %v1325_v34  ;;  %v1327_v2 = vrot.slane %v1325_v34, 4  ;;  %v4687_v9 = vcombine.low %v5727_v3, %v4455_v11 }
  0x79   : > { %v1333_v22 = vsel %vm4477_vm7, %v3235_v0, %v1332_v35  ;;  %v1334_v44 = vrot.slane %v1332_v35, 4  ;;  %v3236_v4 = vrot.slane %v5727_v3, 9  ;;  %v1339_v41 = vrot.slane %v4455_v11, 5  ;;  %v5731_v0 = vld [vmem:[#allocation9_spill] sm:$0xff] }
  0x7a   : > { %v1294_v49 = vsel %vm4477_vm7, %v1292_v55, %v1293_v23  ;;  %v1304_v7 = vrot.slane %v5728_v57, 5  ;;  %v1329_v29 = vsel %vm4477_vm7, %v1327_v2, %v1328_v31  ;;  %v1342_v24 = vrot.slane %v4466_v58, 5  ;;  %v5729_v55 = vld [vmem:[#allocation6_spill] sm:$0xff] }
  0x7b   : > { %3619 = vmatmul.mubr.msk.bf16.gmra.mxu0 %vm707_vm3, %v4623_v30  ;;  %v4703_v52 = vcombine.low %v1326_v25, %v1329_v29  ;;  %v1336_v61 = vsel %vm4477_vm7, %v1334_v44, %v1335_v27  ;;  %v1340_v11 = vsel %vm4477_vm7, %v3236_v4, %v1339_v41  ;;  %v1341_v38 = vrot.slane %v1339_v41, 4  ;;  %v5732_v27 = vld [vmem:[#allocation12_spill] sm:$0xff]  ;;  %v4790_v4 = vld [vmem:[%s4109_s9 + $0xc0] sm:$0xf]  ;;  %v265_v41 = vld [vmem:[%s4109_s9 + $0xc8] sm:$0x1] }
  0x7c   : > { %3622 = vmatprep.mubr.msk.bf16.mxu0 %vm707_vm3, %v4625_v1  ;;  %v4711_v23 = vcombine.low %v1284_v20, %v1287_v54  ;;  %v3230_v34 = vrot.slane %v5729_v55, 9  ;;  %v4714_v58 = vcombine.low %v1333_v22, %v1336_v61  ;;  %v4716_v8 = vcombine.low %v1291_v48, %v1294_v49  ;;  %v5733_v61 = vld [vmem:[#allocation10_spill] sm:$0xff] }
  0x7d   : > { %v1299_v31 = vrot.slane %v1297_v39, 4  ;;  %v1300_v36 = vrot.slane %v5730_v42, 5  ;;  %v1343_v26 = vsel %vm4477_vm7, %v1341_v38, %v1342_v24  ;;  %v3231_v35 = vrot.slane %v5731_v0, 9  ;;  %v5735_v42 = vld [vmem:[#allocation16_spill] sm:$0xff] }
  0x7e   : > { %3585 = vmatmul.mubr.msk.bf16.gmra.mxu1 %vm707_vm3, %v4615_v56  ;;  %v1306_v40 = vrot.slane %v1304_v7, 4  ;;  %v1307_v25 = vrot.slane %v5732_v27, 5  ;;  %v4723_v2 = vcombine.low %v1340_v11, %v1343_v26  ;;  %v4727_v20 = vcombine.low %v4426_v51, %v4433_v62  ;;  %v5739_v26 = vld [vmem:[#allocation8_spill] sm:$0xff] }
  0x7f   : > { %3588 = vmatprep.mubr.msk.bf16.mxu1 %vm707_vm3, %v4619_v17  ;;  %v4733_v48 = vcombine.low %v4131_v13, %v4136_v16  ;;  %v1298_v54 = vsel %vm4477_vm7, %v3230_v34, %v1297_v39  ;;  %v1301_v3 = vsel %vm4477_vm7, %v1299_v31, %v1300_v36  ;;  %v1305_v51 = vsel %vm4477_vm7, %v3231_v35, %v1304_v7  ;;  %v5734_v34 = vld [vmem:[#allocation14_spill] sm:$0xff]  ;;  %v5738_v36 = vld [vmem:[#allocation27_spill] sm:$0xff] }
  0x80   : > { %v1308_v62 = vsel %vm4477_vm7, %v1306_v40, %v1307_v25  ;;  %v4749_v13 = vcombine.low %v1298_v54, %v1301_v3  ;;  %v4755_v39 = vcombine.low %v5729_v55, %v4176_v59  ;;  %v4761_v22 = vcombine.low %v5731_v0, %v5728_v57  ;;  %v4784_v59 = vld [vmem:[%s4109_s9 + $0xc4] sm:$0xf]  ;;  %v3362_v55 = vld [vmem:[%s5642_s1 + $0x10] sm:$0x3] }
  0x81   : > { %v4751_v16 = vcombine.low %v1305_v51, %v1308_v62  ;;  %v2075_v44 = vrot.slane %v4784_v59, 5  ;;  %v3306_v49 = vrot.slane %v4790_v4, 9  ;;  %v2078_v7 = vrot.slane %v265_v41, 5  ;;  %v5740_v0 = vld [vmem:[#allocation13_spill] sm:$0xff]  ;;  %v5741_v35 = vld [vmem:[#allocation15_spill] sm:$0xff] }
  0x82   : > { %v2295_v38 = vsel %vm756_vm0, %v4561_v46, 0  ;;  %v2089_v31 = vsel %vm756_vm0, %v4578_v19, 0  ;;  %v5736_v46 = vld [vmem:[#allocation18_spill] sm:$0xff]  ;;  %v5742_v40 = vld [vmem:[#allocation17_spill] sm:$0xff]  ;;  %v1845_v27 = vshrl.u32 %v4790_v4, 16  ;;  %v1848_v25 = vshll.u32 %v4790_v4, 16 }
  0x83   : > { %3623 = vmatmul.mubr.msk.bf16.gmra.mxu0 %vm707_vm3, %v4711_v23  ;;  %v2077_v57 = vrot.slane %v2075_v44, 4  ;;  %v2076_v29 = vsel %vm4477_vm7, %v3306_v49, %v2075_v44  ;;  %v5737_v19 = vld [vmem:[#allocation22_spill] sm:$0xff]  ;;  %v1858_v54 = vshrl.u32 %v4784_v59, 16  ;;  %v1854_v3 = vshll.u32 %v4784_v59, 16 }
  0x84   : > { %3626 = vmatprep.mubr.msk.bf16.mxu0 %vm707_vm3, %v4716_v8  ;;  %v1847_v51 = vrot.slane %v1845_v27, 4  ;;  %v1850_v62 = vrot.slane %v1848_v25, 5 }
  0x85   : > { %v2079_v24 = vsel %vm4477_vm7, %v2077_v57, %v2078_v7  ;;  %v1856_v44 = vrot.slane %v1854_v3, 5  ;;  %v1860_v49 = vrot.slane %v1858_v54, 4  ;;  %v5743_v57 = vld [vmem:[#allocation20_spill] sm:$0xff]  ;;  %v5744_v7 = vld [vmem:[#allocation25_spill] sm:$0xff]  ;;  %v3271_v3 = vcombine.low %v4790_v4, %v4784_v59 }
  0x86   : > { %3589 = vmatmul.mubr.msk.bf16.gmra.mxu1 %vm707_vm3, %v4727_v20  ;;  %v4802_v11 = vcombine.low %v2076_v29, %v2079_v24  ;;  %v1851_v29 = vor.u32 %v1850_v62, %v1847_v51  ;;  %v2735_v51 = vsel %vm756_vm0, %v3362_v55, 0 }
  0x87   : > { %3592 = vmatprep.mubr.msk.bf16.mxu1 %vm707_vm3, %v4733_v48  ;;  %v1861_v24 = vor.u32 %v1860_v49, %v1856_v44 }
  0x8b   : > { %3627 = vmatmul.mubr.msk.bf16.gmra.mxu0 %vm707_vm3, %v4749_v13 }
  0x8c   : > { %3630 = vmatprep.mubr.msk.bf16.mxu0 %vm707_vm3, %v4751_v16 }
  0x8e   : > { %3593 = vmatmul.mubr.msk.bf16.gmra.mxu1 %vm707_vm3, %v4755_v39 }
  0x8f   : > { %3596 = vmatprep.mubr.msk.bf16.mxu1 %vm707_vm3, %v4761_v22 }
  0x93   : > { %3631 = vmatmul.mubr.msk.bf16.gmra.mxu0 %vm707_vm3, %v4666_v21 }
  0x94   : > { %3634 = vmatprep.mubr.msk.bf16.mxu0 %vm707_vm3, %v4681_v50 }
  0x96   : > { %3597 = vmatmul.mubr.msk.bf16.gmra.mxu1 %vm707_vm3, %v4630_v18 }
  0x97   : > { %3600 = vmatprep.mubr.msk.bf16.mxu1 %vm707_vm3, %v4643_v6 }
  0x9b   : > { %3635 = vmatmul.mubr.msk.bf16.gmra.mxu0 %vm707_vm3, %v4703_v52 }
  0x9c   : > { %3638 = vmatprep.mubr.msk.bf16.mxu0 %vm707_vm3, %v4714_v58 }
  0x9e   : > { %3601 = vmatmul.mubr.msk.bf16.gmra.mxu1 %vm707_vm3, %v4657_v43 }
  0x9f   : > { %3604 = vmatprep.mubr.msk.bf16.mxu1 %vm707_vm3, %v4672_v28 }
  0xa3   : > { %3639 = vmatmul.mubr.msk.bf16.gmra.mxu0 %vm707_vm3, %v4723_v2 }
  0xa4   : > { %3678 = vmatprep.mubr.msk.bf16.mxu0 %vm707_vm3, %v5733_v61  ;;  %v1864_v61 = vshll.u32 %v265_v41, 16 }
  0xa6   : > { %3605 = vmatmul.mubr.msk.bf16.gmra.mxu1 %vm707_vm3, %v4687_v9  ;;  %v1866_v27 = vrot.slane %v1864_v61, 5  ;;  %v4994_v61 = vld [vmem:[%s4109_s9 + $0xd0] sm:$0xf] }
  0xa7   : > { %3644 = vmatprep.mubr.msk.bf16.mxu1 %vm707_vm3, %v4489_v45  ;;  %v3343_v45 = vld [vmem:[%s5642_s1 + $0xe] sm:$0x3] }
  0xa8   : > { %v2523_v62 = vsel %vm756_vm0, %v3343_v45, 0 }
  0xab   : > { %3679 = vmatmul.mubr.msk.bf16.vlgmr.msra.gmra.mxu0 %vm707_vm3, %v5734_v34 }
  0xac   : > { %3745 = vmatpush3.bf16.msra.mxu0 %v2295_v38  ;;  %3682 = vmatprep.mubr.msk.bf16.mxu0 %vm707_vm3, %v5735_v42  ;;  %v1852_v38 = vrot.slane %v1851_v29, 4 }
  0xad   : > { %3857 = vmatprep.subr.msk.bf16.mxu0 %vm756_vm0, %v3362_v55 }
  0xae   : > { %3645 = vmatmul.mubr.msk.bf16.vlgmr.msra.gmra.mxu1 %vm707_vm3, %v4516_v63  ;;  %v1857_v25 = vsel %vm4154_vm4, %v1852_v38, %v1856_v44 }
  0xaf   : > { %3711 = vmatpush3.bf16.msra.mxu1 %v2089_v31  ;;  %3648 = vmatprep.mubr.msk.bf16.mxu1 %vm707_vm3, %v4607_v53  ;;  %v1862_v31 = vrot.slane %v1861_v24, 4 }
  0xb0   : > { %3856 = vmatprep.subr.msk.bf16.mxu1 %vm756_vm0, %v3343_v45 }
  0xb1   : > { %v1867_v41 = vsel %vm4154_vm4, %v1862_v31, %v1866_v27 }
  0xb2   : > { %v4884_v54 = vcombine.low %v1857_v25, %v1867_v41 }
  0xb3   : > { %3683 = vmatmul.mubr.msk.bf16.gmra.mxu0 %vm707_vm3, %v5736_v46 }
  0xb4   : > { %3686 = vmatprep.mubr.msk.bf16.mxu0 %vm707_vm3, %v5737_v19  ;;  %5745 = vst [vmem:[#allocation19_spill] sm:$0xff] %v4884_v54 }
  0xb6   : > { %3649 = vmatmul.mubr.msk.bf16.gmra.mxu1 %vm707_vm3, %v4611_v33 }
  0xb7   : > { %3652 = vmatprep.mubr.msk.bf16.mxu1 %vm707_vm3, %v4615_v56 }
  0xbb   : > { %3687 = vmatmul.mubr.msk.bf16.gmra.mxu0 %vm707_vm3, %v5738_v36 }
  0xbc   : > { %3690 = vmatprep.mubr.msk.bf16.mxu0 %vm707_vm3, %v4498_v15 }
  0xbe   : > { %3653 = vmatmul.mubr.msk.bf16.gmra.mxu1 %vm707_vm3, %v4619_v17 }
  0xbf   : > { %3656 = vmatprep.mubr.msk.bf16.mxu1 %vm707_vm3, %v4727_v20 }
  0xc3   : > { %3691 = vmatmul.mubr.msk.bf16.gmra.mxu0 %vm707_vm3, %v5739_v26 }
  0xc4   : > { %3694 = vmatprep.mubr.msk.bf16.mxu0 %vm707_vm3, %v5740_v0 }
  0xc6   : > { %3657 = vmatmul.mubr.msk.bf16.gmra.mxu1 %vm707_vm3, %v4733_v48 }
  0xc7   : > { %3660 = vmatprep.mubr.msk.bf16.mxu1 %vm707_vm3, %v4755_v39 }
  0xcb   : > { %3695 = vmatmul.mubr.msk.bf16.gmra.mxu0 %vm707_vm3, %v5741_v35 }
  0xcc   : > { %3698 = vmatprep.mubr.msk.bf16.mxu0 %vm707_vm3, %v5742_v40 }
  0xce   : > { %3661 = vmatmul.mubr.msk.bf16.gmra.mxu1 %vm707_vm3, %v4761_v22 }
  0xcf   : > { %3664 = vmatprep.mubr.msk.bf16.mxu1 %vm707_vm3, %v4630_v18 }
  0xd3   : > { %3699 = vmatmul.mubr.msk.bf16.gmra.mxu0 %vm707_vm3, %v5743_v57 }
  0xd4   : > { %3702 = vmatprep.mubr.msk.bf16.mxu0 %vm707_vm3, %v5744_v7 }
  0xd6   : > { %3665 = vmatmul.mubr.msk.bf16.gmra.mxu1 %vm707_vm3, %v4643_v6 }
  0xd7   : > { %3668 = vmatprep.mubr.msk.bf16.mxu1 %vm707_vm3, %v4657_v43 }
  0xdb   : > { %3703 = vmatmul.mubr.msk.bf16.gmra.mxu0 %vm707_vm3, %v4472_v5 }
  0xdc   : > { %3706 = vmatprep.mubr.msk.bf16.mxu0 %vm707_vm3, %v4526_v12 }
  0xde   : > { %3669 = vmatmul.mubr.msk.bf16.gmra.mxu1 %vm707_vm3, %v4672_v28 }
  0xdf   : > { %3672 = vmatprep.mubr.msk.bf16.mxu1 %vm707_vm3, %v4687_v9 }
  0xe3   : > { %3707 = vmatmul.mubr.msk.bf16.gmra.mxu0 %vm707_vm3, %v4884_v54 }
  0xe4   : > { %3746 = vmatprep.mubr.msk.bf16.mxu0 %vm707_vm3, %v4516_v63 }
  0xe6   : > { %3673 = vmatmul.mubr.msk.bf16.gmra.mxu1 %vm707_vm3, %v3271_v3 }
  0xe7   : > { %3712 = vmatprep.mubr.msk.bf16.mxu1 %vm707_vm3, %v4523_v47 }
  0xeb   : > { %3747 = vmatmul.mubr.msk.bf16.vlgmr.msra.gmra.mxu0 %vm707_vm3, %v4607_v53 }
  0xec   : > { %3813 = vmatpush3.bf16.msra.mxu0 %v2735_v51  ;;  %3750 = vmatprep.mubr.msk.bf16.mxu0 %vm707_vm3, %v4611_v33 }
  0xee   : > { %3713 = vmatmul.mubr.msk.bf16.vlgmr.msra.gmra.mxu1 %vm707_vm3, %v4546_v37 }
  0xef   : > { %3779 = vmatpush3.bf16.msra.mxu1 %v2523_v62  ;;  %3716 = vmatprep.mubr.msk.bf16.mxu1 %vm707_vm3, %v4586_v14  ;;  %v4907_v63 = vpop.f32.mrf.mxu0 }
  0xf1   : > { %v4917_v53 = vpop.f32.mrf.mxu0 }
  0xf3   : > { %3751 = vmatmul.mubr.msk.bf16.gmra.mxu0 %vm707_vm3, %v4615_v56  ;;  %v4923_v56 = vpop.f32.mrf.mxu0 }
  0xf4   : > { %3754 = vmatprep.mubr.msk.bf16.mxu0 %vm707_vm3, %v4619_v17  ;;  %v4913_v47 = vpop.f32.mrf.mxu1 }
  0xf5   : > { %v4933_v59 = vpop.f32.mrf.mxu0 }
  0xf6   : > { %3717 = vmatmul.mubr.msk.bf16.gmra.mxu1 %vm707_vm3, %v4588_v10  ;;  %v4919_v33 = vpop.f32.mrf.mxu1 }
  0xf7   : > { %3720 = vmatprep.mubr.msk.bf16.mxu1 %vm707_vm3, %v4623_v30 }
  0xf8   : > { %v4929_v17 = vpop.f32.mrf.mxu1 }
  0xfa   : > { %v4935_v4 = vpop.f32.mrf.mxu1 }
  0xfb   : > { %3755 = vmatmul.mubr.msk.bf16.gmra.mxu0 %vm707_vm3, %v4727_v20 }
  0xfc   : > { %3758 = vmatprep.mubr.msk.bf16.mxu0 %vm707_vm3, %v4733_v48 }
  0xfe   : > { %3721 = vmatmul.mubr.msk.bf16.gmra.mxu1 %vm707_vm3, %v4625_v1 }
  0xff   : > { %3724 = vmatprep.mubr.msk.bf16.mxu1 %vm707_vm3, %v4711_v23 }
 0x100   : > { %v4939_v20 = vpop.f32.mrf.mxu0 }
 0x102   : > { %v4949_v55 = vpop.f32.mrf.mxu0 }
 0x103   : > { %3759 = vmatmul.mubr.msk.bf16.gmra.mxu0 %vm707_vm3, %v4755_v39 }
 0x104   : > { %3762 = vmatprep.mubr.msk.bf16.mxu0 %vm707_vm3, %v4761_v22  ;;  %v4945_v48 = vpop.f32.mrf.mxu1  ;;  %v4955_v39 = vpop.f32.mrf.mxu0 }
 0x106   : > { %3725 = vmatmul.mubr.msk.bf16.gmra.mxu1 %vm707_vm3, %v4716_v8  ;;  %v4951_v45 = vpop.f32.mrf.mxu1  ;;  %v4965_v44 = vpop.f32.mrf.mxu0 }
 0x107   : > { %3728 = vmatprep.mubr.msk.bf16.mxu1 %vm707_vm3, %v4749_v13 }
 0x108   : > { %v4961_v22 = vpop.f32.mrf.mxu1 }
 0x10a   : > { %v4967_v49 = vpop.f32.mrf.mxu1 }
 0x10b   : > { %3763 = vmatmul.mubr.msk.bf16.gmra.mxu0 %vm707_vm3, %v4630_v18 }
 0x10c   : > { %3766 = vmatprep.mubr.msk.bf16.mxu0 %vm707_vm3, %v4643_v6 }
 0x10e   : > { %3729 = vmatmul.mubr.msk.bf16.gmra.mxu1 %vm707_vm3, %v4751_v16 }
 0x10f   : > { %3732 = vmatprep.mubr.msk.bf16.mxu1 %vm707_vm3, %v4666_v21 }
 0x111   : > { %v4971_v18 = vpop.f32.mrf.mxu0 }
 0x113   : > { %3767 = vmatmul.mubr.msk.bf16.gmra.mxu0 %vm707_vm3, %v4657_v43  ;;  %v4981_v29 = vpop.f32.mrf.mxu0 }
 0x114   : > { %3770 = vmatprep.mubr.msk.bf16.mxu0 %vm707_vm3, %v4672_v28  ;;  %v4991_v28 = vld [vmem:[%s4109_s9 + $0xcc] sm:$0xf] }
 0x115   : > { %v4987_v43 = vpop.f32.mrf.mxu0 }
 0x116   : > { %3733 = vmatmul.mubr.msk.bf16.gmra.mxu1 %vm707_vm3, %v4681_v50  ;;  %v4977_v6 = vpop.f32.mrf.mxu1 }
 0x117   : > { %5746 = vst [vmem:[#allocation23_spill] sm:$0xff] %v4977_v6  ;;  %3736 = vmatprep.mubr.msk.bf16.mxu1 %vm707_vm3, %v4703_v52  ;;  %v5000_v31 = vpop.f32.mrf.mxu0 }
 0x118   : > { %v4983_v24 = vpop.f32.mrf.mxu1 }
 0x119   : > { %5747 = vst [vmem:[#allocation21_spill] sm:$0xff] %v4983_v24 }
 0x11a   : > { %v4998_v38 = vpop.f32.mrf.mxu1 }
 0x11b   : > { %3771 = vmatmul.mubr.msk.bf16.gmra.mxu0 %vm707_vm3, %v4687_v9  ;;  %5748 = vst [vmem:[#allocation24_spill] sm:$0xff] %v4998_v38  ;;  %v3326_v9 = vcombine.low %v4991_v28, %v4994_v61 }
 0x11c   : > { %3774 = vmatprep.mubr.msk.bf16.mxu0 %vm707_vm3, %v3271_v3  ;;  %v5006_v27 = vpop.f32.mrf.mxu1 }
 0x11d   : > { %5749 = vst [vmem:[#allocation26_spill] sm:$0xff] %v5006_v27 }
 0x11e   : > { %3737 = vmatmul.mubr.msk.bf16.gmra.mxu1 %vm707_vm3, %v4714_v58 }
 0x11f   : > { %3740 = vmatprep.mubr.msk.bf16.mxu1 %vm707_vm3, %v4723_v2 }
 0x123   : > { %v5008_v25 = vpop.f32.mrf.mxu0  ;;  %3775 = vmatmul.mubr.msk.bf16.gmra.mxu0 %vm707_vm3, %v3326_v9 }
 0x124   : > { %3814 = vmatprep.mubr.msk.bf16.mxu0 %vm707_vm3, %v4546_v37 }
 0x125   : > { %v5013_v41 = vpop.f32.mrf.mxu0 }
 0x126   : > { %v5015_v3 = vpop.f32.mrf.mxu1  ;;  %3741 = vmatmul.mubr.msk.bf16.gmra.mxu1 %vm707_vm3, %v4802_v11 }
 0x127   : > { %5750 = vst [vmem:[#allocation11_spill] sm:$0xff] %v5015_v3  ;;  %v5019_v51 = vpop.f32.mrf.mxu0  ;;  %3780 = vmatprep.mubr.msk.bf16.mxu1 %vm707_vm3, %v5734_v34 }
 0x128   : > { %v5023_v62 = vpop.f32.mrf.mxu1 }
 0x129   : > { %5751 = vst [vmem:[#allocation6_spill] sm:$0xff] %v5023_v62  ;;  %v5025_v27 = vpop.f32.mrf.mxu0 }
 0x12a   : > { %v5027_v9 = vpop.f32.mrf.mxu1 }
 0x12b   : > { %5752 = vst [vmem:[#allocation7_spill] sm:$0xff] %v5027_v9  ;;  %v3612_v38 = vpop.f32.mrf.mxu0  ;;  %3815 = vmatmul.mubr.msk.bf16.vlgmr.msra.gmra.mxu0 %vm707_vm3, %v4586_v14 }
 0x12c   : > { %v5031_v37 = vpop.f32.mrf.mxu1  ;;  %3818 = vmatprep.mubr.msk.bf16.mxu0 %vm707_vm3, %v4588_v10 }
 0x12d   : > { %5753 = vst [vmem:[#allocation9_spill] sm:$0xff] %v5031_v37  ;;  %v1479_v3 = vpop.f32.mrf.mxu0 }
 0x12e   : > { %v3578_v24 = vpop.f32.mrf.mxu1  ;;  %3781 = vmatmul.mubr.msk.bf16.vlgmr.msra.gmra.mxu1 %vm707_vm3, %v5735_v42 }
 0x12f   : > { %v1095_v34 = vadd.f32 %v3578_v24, %v4907_v63  ;;  %v3613_v62 = vpop.f32.mrf.mxu0  ;;  %3784 = vmatprep.mubr.msk.bf16.mxu1 %vm707_vm3, %v5736_v46 }
 0x130   : > { %v1086_v9 = vpop.f32.mrf.mxu1 }
 0x131   : > { %v5040_v54 = vadd.f32 %v3612_v38, %v1095_v34  ;;  %v1087_v14 = vadd.f32 %v1086_v9, %v4917_v53  ;;  %v1482_v37 = vpop.f32.mrf.mxu0 }
 0x132   : > { %v3579_v6 = vpop.f32.mrf.mxu1 }
 0x133   : > { %v5043_v32 = vadd.f32 %v1479_v3, %v1087_v14  ;;  %v1098_v10 = vadd.f32 %v3579_v6, %v4923_v56  ;;  %v3616_v12 = vpop.f32.mrf.mxu0  ;;  %3819 = vmatmul.mubr.msk.bf16.gmra.mxu0 %vm707_vm3, %v4623_v30 }
 0x134   : > { %v1089_v42 = vpop.f32.mrf.mxu1  ;;  %3822 = vmatprep.mubr.msk.bf16.mxu0 %vm707_vm3, %v4625_v1 }
 0x135   : > { %v5050_v46 = vadd.f32 %v3613_v62, %v1098_v10  ;;  %v1090_v63 = vadd.f32 %v1089_v42, %v4933_v59  ;;  %v1495_v24 = vpop.f32.mrf.mxu0 }
 0x136   : > { %v3582_v53 = vpop.f32.mrf.mxu1  ;;  %3785 = vmatmul.mubr.msk.bf16.gmra.mxu1 %vm707_vm3, %v5737_v19 }
 0x137   : > { %v5055_v38 = vadd.f32 %v1482_v37, %v1090_v63  ;;  %v1111_v56 = vadd.f32 %v3582_v53, %v4939_v20  ;;  %v3617_v6 = vpop.f32.mrf.mxu0  ;;  %3788 = vmatprep.mubr.msk.bf16.mxu1 %vm707_vm3, %v5738_v36 }
 0x138   : > { %v1102_v30 = vpop.f32.mrf.mxu1 }
 0x139   : > { %v5060_v3 = vadd.f32 %v3616_v12, %v1111_v56  ;;  %v1103_v1 = vadd.f32 %v1102_v30, %v4949_v55  ;;  %v1498_v62 = vpop.f32.mrf.mxu0 }
 0x13a   : > { %v3583_v59 = vpop.f32.mrf.mxu1 }
 0x13b   : > { %v5063_v9 = vadd.f32 %v1495_v24, %v1103_v1  ;;  %v1114_v34 = vadd.f32 %v3583_v59, %v4955_v39  ;;  %v3620_v19 = vpop.f32.mrf.mxu0  ;;  %3823 = vmatmul.mubr.msk.bf16.gmra.mxu0 %vm707_vm3, %v4711_v23 }
 0x13c   : > { %v1105_v20 = vpop.f32.mrf.mxu1  ;;  %3826 = vmatprep.mubr.msk.bf16.mxu0 %vm707_vm3, %v4716_v8 }
 0x13d   : > { %v5070_v36 = vadd.f32 %v3617_v6, %v1114_v34  ;;  %v1106_v12 = vadd.f32 %v1105_v20, %v4965_v44  ;;  %v1511_v37 = vpop.f32.mrf.mxu0 }
 0x13e   : > { %v3586_v55 = vpop.f32.mrf.mxu1  ;;  %3789 = vmatmul.mubr.msk.bf16.gmra.mxu1 %vm707_vm3, %v4498_v15 }
 0x13f   : > { %v5075_v14 = vadd.f32 %v1498_v62, %v1106_v12  ;;  %v1127_v39 = vadd.f32 %v3586_v55, %v4971_v18  ;;  %v3621_v10 = vpop.f32.mrf.mxu0  ;;  %3792 = vmatprep.mubr.msk.bf16.mxu1 %vm707_vm3, %v5739_v26 }
 0x140   : > { %v1118_v23 = vpop.f32.mrf.mxu1 }
 0x141   : > { %v5080_v42 = vadd.f32 %v3620_v19, %v1127_v39  ;;  %v1119_v8 = vadd.f32 %v1118_v23, %v4981_v29  ;;  %v1514_v63 = vpop.f32.mrf.mxu0 }
 0x142   : > { %v3587_v44 = vpop.f32.mrf.mxu1 }
 0x143   : > { %v5083_v24 = vadd.f32 %v1511_v37, %v1119_v8  ;;  %v1130_v53 = vadd.f32 %v3587_v44, %v4987_v43  ;;  %v3624_v15 = vpop.f32.mrf.mxu0  ;;  %3827 = vmatmul.mubr.msk.bf16.gmra.mxu0 %vm707_vm3, %v4749_v13  ;;  %v2494_v37 = vshll.u32 %v4991_v28, 16 }
 0x144   : > { %v1121_v18 = vpop.f32.mrf.mxu1  ;;  %3830 = vmatprep.mubr.msk.bf16.mxu0 %vm707_vm3, %v4751_v16 }
 0x145   : > { %v5090_v26 = vadd.f32 %v3621_v10, %v1130_v53  ;;  %v1122_v56 = vadd.f32 %v1121_v18, %v5000_v31  ;;  %v1527_v6 = vpop.f32.mrf.mxu0  ;;  %v2496_v44 = vrot.slane %v2494_v37, 5 }
 0x146   : > { %v3590_v29 = vpop.f32.mrf.mxu1  ;;  %3793 = vmatmul.mubr.msk.bf16.gmra.mxu1 %vm707_vm3, %v5740_v0 }
 0x147   : > { %v5095_v30 = vadd.f32 %v1514_v63, %v1122_v56  ;;  %v1143_v43 = vadd.f32 %v3590_v29, %v5008_v25  ;;  %v3625_v1 = vpop.f32.mrf.mxu0  ;;  %3796 = vmatprep.mubr.msk.bf16.mxu1 %vm707_vm3, %v5741_v35 }
 0x148   : > { %v1134_v13 = vpop.f32.mrf.mxu1 }
 0x149   : > { %v5100_v62 = vadd.f32 %v3624_v15, %v1143_v43  ;;  %v1135_v16 = vadd.f32 %v1134_v13, %v5013_v41  ;;  %v1530_v59 = vpop.f32.mrf.mxu0  ;;  %v2491_v41 = vshrl.u32 %v4991_v28, 16 }
 0x14a   : > { %v3591_v31 = vpop.f32.mrf.mxu1 }
 0x14b   : > { %v5103_v34 = vadd.f32 %v1527_v6, %v1135_v16  ;;  %v1146_v19 = vadd.f32 %v3591_v31, %v5019_v51  ;;  %v3628_v0 = vpop.f32.mrf.mxu0  ;;  %3831 = vmatmul.mubr.msk.bf16.gmra.mxu0 %vm707_vm3, %v4666_v21  ;;  %v2500_v51 = vshll.u32 %v4994_v61, 16  ;;  %v2504_v21 = vshrl.u32 %v4994_v61, 16 }
 0x14c   : > { %v1137_v25 = vpop.f32.mrf.mxu1  ;;  %3834 = vmatprep.mubr.msk.bf16.mxu0 %vm707_vm3, %v4681_v50 }
 0x14d   : > { %v5110_v35 = vadd.f32 %v3625_v1, %v1146_v19  ;;  %v1138_v20 = vadd.f32 %v1137_v25, %v5025_v27  ;;  %v1543_v12 = vpop.f32.mrf.mxu0  ;;  %v2502_v15 = vrot.slane %v2500_v51, 5  ;;  %v2506_v18 = vrot.slane %v2504_v21, 4 }
 0x14e   : > { %v3594_v55 = vpop.f32.mrf.mxu1  ;;  %3797 = vmatmul.mubr.msk.bf16.gmra.mxu1 %vm707_vm3, %v5742_v40  ;;  %v2493_v40 = vrot.slane %v2491_v41, 4  ;;  %v3361_v19 = vrot.slane %v4991_v28, 9 }
 0x14f   : > { %v5119_v39 = vadd.f32 %v1530_v59, %v1138_v20  ;;  %v1159_v50 = vadd.f32 %v3594_v55, %v4913_v47  ;;  %v3629_v10 = vpop.f32.mrf.mxu0  ;;  %3800 = vmatprep.mubr.msk.bf16.mxu1 %vm707_vm3, %v5743_v57  ;;  %v2721_v57 = vrot.slane %v4994_v61, 5 }
 0x150   : > { %v1150_v27 = vpop.f32.mrf.mxu1 }
 0x151   : > { %v5124_v23 = vadd.f32 %v3628_v0, %v1159_v50  ;;  %v1151_v8 = vadd.f32 %v1150_v27, %v4919_v33  ;;  %v1546_v63 = vpop.f32.mrf.mxu0  ;;  %v268_v33 = vld [vmem:[%s4109_s9 + $0xd4] sm:$0x1]  ;;  %s5447_s9 = scalar_lea.vmem [#allocation2], %s3154_s8 }
 0x152   : > { %v3595_v53 = vpop.f32.mrf.mxu1  ;;  %v2510_v31 = vshll.u32 %v268_v33, 16  ;;  %v2724_v25 = vrot.slane %v268_v33, 5  ;;  %s3048_s11 = sshll.u32 %s5447_s9, 4  ;;  %s5590_s11 = int_to_ptr.vmem [resolvable:$true] %s3048_s11 }
 0x153   : > { %v5127_v56 = vadd.f32 %v1543_v12, %v1151_v8  ;;  %v1162_v47 = vadd.f32 %v3595_v53, %v4929_v17  ;;  %v3632_v6 = vpop.f32.mrf.mxu0  ;;  %3835 = vmatmul.mubr.msk.bf16.gmra.mxu0 %vm707_vm3, %v4703_v52  ;;  %v2497_v17 = vor.u32 %v2496_v44, %v2493_v40  ;;  %s3934_s23 = scalar_lea.vmem %s5590_s11, 4096  ;;  %p3941_p1 = scmp.lt.s32.totalorder %s5590_s11, %s3939_s27 }
 0x154   : > { %v1153_v29 = vpop.f32.mrf.mxu1  ;;  %3838 = vmatprep.mubr.msk.bf16.mxu0 %vm707_vm3, %v4714_v58  ;;  %v2507_v58 = vor.u32 %v2506_v18, %v2502_v15  ;;  %v2512_v28 = vrot.slane %v2510_v31, 5  ;;  %p3935_p12 = scmp.ne.s32.totalorder %s5590_s11, %s3934_s23  ;;  %p3942_p2 = scmp.lt.s32.totalorder %s3940_s28, %s3934_s23 }
 0x155   : > { %v5136_v43 = vadd.f32 %v3629_v10, %v1162_v47  ;;  %v1154_v1 = vadd.f32 %v1153_v29, %v4935_v4  ;;  %v1559_v13 = vpop.f32.mrf.mxu0  ;;  %v2723_v4 = vrot.slane %v2721_v57, 4  ;;  %v2498_v37 = vrot.slane %v2497_v17, 4  ;;  %v5757_v47 = vld [vmem:[#allocation19_spill] sm:$0xff]  ;;  %v5758_v29 = vld [vmem:[#allocation21_spill] sm:$0xff]  ;;  %v5759_v17 = vld [vmem:[#allocation24_spill] sm:$0xff] }
 0x156   : > { %v3598_v16 = vpop.f32.mrf.mxu1  ;;  %3801 = vmatmul.mubr.msk.bf16.gmra.mxu1 %vm707_vm3, %v5744_v7  ;;  %p3936_p13 = pnand %p3935_p12, %p4075_p4  ;;  %p3943_p3 = por %p3942_p2, %p3941_p1 }
 0x157   : > { %v5141_v59 = vadd.f32 %v1546_v63, %v1154_v1  ;;  %v1175_v52 = vadd.f32 %v3598_v16, %v4945_v48  ;;  %v3633_v61 = vpop.f32.mrf.mxu0  ;;  %3804 = vmatprep.mubr.msk.bf16.mxu1 %vm707_vm3, %v4472_v5  ;;  %v2508_v5 = vrot.slane %v2507_v58, 4  ;;  %v2725_v50 = vsel %vm4477_vm7, %v2723_v4, %v2724_v25  ;;  %v5754_v63 = vld [vmem:[#allocation28_spill] sm:$0xff] }
 0x158   : > { %v1166_v0 = vpop.f32.mrf.mxu1  ;;  %v2503_v40 = vsel %vm4154_vm4, %v2498_v37, %v2502_v15  ;;  %p3937_p0 = pneg %p3936_p13 }
 0x159   : > { %v5147_v20 = vadd.f32 %v3632_v6, %v1175_v52  ;;  %v1167_v7 = vadd.f32 %v1166_v0, %v4951_v45  ;;  %v1562_v12 = vpop.f32.mrf.mxu0  ;;  %v2722_v45 = vsel %vm4477_vm7, %v3361_v19, %v2721_v57  ;;  %v2513_v60 = vsel %vm4154_vm4, %v2508_v5, %v2512_v28  ;;  %v5760_v19 = vld [vmem:[#allocation26_spill] sm:$0xff] }
 0x15a   : > { %v3599_v41 = vpop.f32.mrf.mxu1  ;;  %v3344_v15 = vcombine.low %v2503_v40, %v2513_v60  ;;  %v5762_v5 = vld [vmem:[#allocation6_spill] sm:$0xff]  ;;  %v5764_v40 = vld [vmem:[#allocation9_spill] sm:$0xff]  ;;  %p3944_p5 = pnand %p3943_p3, %p3937_p0 }
 0x15b   : > { %v5150_v55 = vadd.f32 %v1559_v13, %v1167_v7  ;;  %v1178_v48 = vadd.f32 %v3599_v41, %v4961_v22  ;;  %v3636_v51 = vpop.f32.mrf.mxu0  ;;  %3839 = vmatmul.mubr.msk.bf16.gmra.mxu0 %vm707_vm3, %v4723_v2 }
 0x15c   : > { %v1169_v21 = vpop.f32.mrf.mxu1  ;;  %3842 = vmatprep.mubr.msk.bf16.mxu0 %vm707_vm3, %v4802_v11  ;;  %v5756_v11 = vld [vmem:[#allocation23_spill] sm:$0xff] }
 0x15d   : > { %v5161_v10 = vadd.f32 %v3633_v61, %v1178_v48  ;;  %v1170_v22 = vadd.f32 %v1169_v21, %v4967_v49  ;;  %v1575_v27 = vpop.f32.mrf.mxu0  ;;  %v3363_v49 = vcombine.low %v2722_v45, %v2725_v50 }
 0x15e   : > { %v3602_v8 = vpop.f32.mrf.mxu1  ;;  %3805 = vmatmul.mubr.msk.bf16.gmra.mxu1 %vm707_vm3, %v5754_v63 }
 0x15f   : > { %v5168_v44 = vadd.f32 %v1562_v12, %v1170_v22  ;;  %v1191_v53 = vadd.f32 %v3602_v8, %v5756_v11  ;;  %v3637_v18 = vpop.f32.mrf.mxu0  ;;  %3808 = vmatprep.mubr.msk.bf16.mxu1 %vm707_vm3, %v5757_v47  ;;  %v5761_v12 = vld [vmem:[#allocation11_spill] sm:$0xff] }
 0x160   : > { %v1182_v6 = vpop.f32.mrf.mxu1  ;;  %v5763_v22 = vld [vmem:[#allocation7_spill] sm:$0xff] }
 0x161   : > { %v5175_v57 = vadd.f32 %v3636_v51, %v1191_v53  ;;  %v1183_v33 = vadd.f32 %v1182_v6, %v5758_v29  ;;  %v1578_v1 = vpop.f32.mrf.mxu0 }
 0x162   : > { %v3603_v13 = vpop.f32.mrf.mxu1 }
 0x163   : > { %v5178_v16 = vadd.f32 %v1575_v27, %v1183_v33  ;;  %v1194_v52 = vadd.f32 %v3603_v13, %v5759_v17  ;;  %v3640_v61 = vpop.f32.mrf.mxu0  ;;  %3843 = vmatmul.mubr.msk.bf16.gmra.mxu0 %vm707_vm3, %v3363_v49 }
 0x164   : > { %v1185_v58 = vpop.f32.mrf.mxu1 }
 0x165   : > { %v5182_v31 = vadd.f32 %v3637_v18, %v1194_v52  ;;  %v1186_v0 = vadd.f32 %v1185_v58, %v5760_v19  ;;  %v1591_v4 = vpop.f32.mrf.mxu0 }
 0x166   : > { %v3606_v25 = vpop.f32.mrf.mxu1  ;;  %3809 = vmatmul.mubr.msk.bf16.gmra.mxu1 %vm707_vm3, %v3344_v15 }
 0x167   : > { %v5186_v7 = vadd.f32 %v1578_v1, %v1186_v0  ;;  %v1207_v41 = vadd.f32 %v3606_v25, %v5761_v12  ;;  %v3641_v37 = vpop.f32.mrf.mxu0 }
 0x168   : > { %v1198_v48 = vpop.f32.mrf.mxu1 }
 0x169   : > { %v5189_v51 = vadd.f32 %v3640_v61, %v1207_v41  ;;  %v1199_v28 = vadd.f32 %v1198_v48, %v5762_v5  ;;  %v1594_v21 = vpop.f32.mrf.mxu0 }
 0x16a   : > { %v3607_v45 = vpop.f32.mrf.mxu1 }
 0x16b   : > { %v5192_v50 = vadd.f32 %v1591_v4, %v1199_v28  ;;  %v1210_v27 = vadd.f32 %v3607_v45, %v5763_v22  ;;  %v3680_v8 = vpop.f32.mrf.mxu0 }
 0x16c   : > { %v1201_v63 = vpop.f32.mrf.mxu1 }
 0x16d   : > { %v5195_v2 = vadd.f32 %v3641_v37, %v1210_v27  ;;  %v1202_v11 = vadd.f32 %v1201_v63, %v5764_v40  ;;  %v1913_v53 = vpop.f32.mrf.mxu0 }
 0x16e   : > { %v3646_v18 = vpop.f32.mrf.mxu1 }
 0x16f   : > { %v5198_v47 = vadd.f32 %v1594_v21, %v1202_v11  ;;  %v1814_v60 = vadd.f32 %v3646_v18, %v5040_v54  ;;  %v3681_v49 = vpop.f32.mrf.mxu0 }
 0x170   : > { %v1685_v6 = vpop.f32.mrf.mxu1 }
 0x171   : > { %v5201_v29 = vadd.f32 %v3680_v8, %v1814_v60  ;;  %v1812_v33 = vadd.f32 %v1685_v6, %v5043_v32  ;;  %v1916_v1 = vpop.f32.mrf.mxu0 }
 0x172   : > { %v3647_v13 = vpop.f32.mrf.mxu1 }
 0x173   : > { %v5204_v15 = vadd.f32 %v1913_v53, %v1812_v33  ;;  %v1815_v17 = vadd.f32 %v3647_v13, %v5050_v46  ;;  %v3684_v52 = vpop.f32.mrf.mxu0 }
 0x174   : > { %v1688_v61 = vpop.f32.mrf.mxu1 }
 0x175   : > { %v5207_v58 = vadd.f32 %v3681_v49, %v1815_v17  ;;  %v1813_v19 = vadd.f32 %v1688_v61, %v5055_v38  ;;  %v1929_v0 = vpop.f32.mrf.mxu0 }
 0x176   : > { %v3650_v54 = vpop.f32.mrf.mxu1 }
 0x177   : > { %v5210_v4 = vadd.f32 %v1916_v1, %v1813_v19  ;;  %v1818_v25 = vadd.f32 %v3650_v54, %v5060_v3  ;;  %v3685_v12 = vpop.f32.mrf.mxu0 }
 0x178   : > { %v1701_v32 = vpop.f32.mrf.mxu1 }
 0x179   : > { %v5213_v41 = vadd.f32 %v3684_v52, %v1818_v25  ;;  %v1816_v37 = vadd.f32 %v1701_v32, %v5063_v9  ;;  %v1932_v48 = vpop.f32.mrf.mxu0 }
 0x17a   : > { %v3651_v46 = vpop.f32.mrf.mxu1 }
 0x17b   : > { %v5216_v5 = vadd.f32 %v1929_v0, %v1816_v37  ;;  %v1819_v28 = vadd.f32 %v3651_v46, %v5070_v36  ;;  %v3688_v21 = vpop.f32.mrf.mxu0 }
 0x17c   : > { %v1704_v38 = vpop.f32.mrf.mxu1 }
 0x17d   : > { %v5219_v45 = vadd.f32 %v3685_v12, %v1819_v28  ;;  %v1817_v22 = vadd.f32 %v1704_v38, %v5075_v14  ;;  %v1945_v27 = vpop.f32.mrf.mxu0 }
 0x17e   : > { %v3654_v3 = vpop.f32.mrf.mxu1 }
 0x17f   : > { %v5222_v8 = vadd.f32 %v1932_v48, %v1817_v22  ;;  %v1822_v63 = vadd.f32 %v3654_v3, %v5080_v42  ;;  %v3689_v40 = vpop.f32.mrf.mxu0 }
 0x180   : > { %v1717_v9 = vpop.f32.mrf.mxu1 }
 0x181   : > { %v5225_v11 = vadd.f32 %v3688_v21, %v1822_v63  ;;  %v1820_v53 = vadd.f32 %v1717_v9, %v5083_v24  ;;  %v1948_v18 = vpop.f32.mrf.mxu0 }
 0x182   : > { %v3655_v36 = vpop.f32.mrf.mxu1 }
 0x183   : > { %v5228_v60 = vadd.f32 %v1945_v27, %v1820_v53  ;;  %v1823_v49 = vadd.f32 %v3655_v36, %v5090_v26  ;;  %v3692_v6 = vpop.f32.mrf.mxu0 }
 0x184   : > { %v1720_v14 = vpop.f32.mrf.mxu1 }
 0x185   : > { %v5231_v33 = vadd.f32 %v3689_v40, %v1823_v49  ;;  %v1821_v1 = vadd.f32 %v1720_v14, %v5095_v30  ;;  %v1961_v13 = vpop.f32.mrf.mxu0 }
 0x186   : > { %v3658_v42 = vpop.f32.mrf.mxu1 }
 0x187   : > { %v5234_v17 = vadd.f32 %v1948_v18, %v1821_v1  ;;  %v1826_v52 = vadd.f32 %v3658_v42, %v5100_v62  ;;  %v3693_v61 = vpop.f32.mrf.mxu0 }
 0x188   : > { %v1733_v24 = vpop.f32.mrf.mxu1 }
 0x189   : > { %v5237_v19 = vadd.f32 %v3692_v6, %v1826_v52  ;;  %v1824_v0 = vadd.f32 %v1733_v24, %v5103_v34  ;;  %v1964_v54 = vpop.f32.mrf.mxu0 }
 0x18a   : > { %v3659_v26 = vpop.f32.mrf.mxu1 }
 0x18b   : > { %v5240_v25 = vadd.f32 %v1961_v13, %v1824_v0  ;;  %v1827_v12 = vadd.f32 %v3659_v26, %v5110_v35  ;;  %v3696_v32 = vpop.f32.mrf.mxu0 }
 0x18c   : > { %v1736_v30 = vpop.f32.mrf.mxu1 }
 0x18d   : > { %v5243_v37 = vadd.f32 %v3693_v61, %v1827_v12  ;;  %v1825_v48 = vadd.f32 %v1736_v30, %v5119_v39  ;;  %v1977_v46 = vpop.f32.mrf.mxu0 }
 0x18e   : > { %v3662_v62 = vpop.f32.mrf.mxu1 }
 0x18f   : > { %v5246_v28 = vadd.f32 %v1964_v54, %v1825_v48  ;;  %v1830_v21 = vadd.f32 %v3662_v62, %v5124_v23  ;;  %v3697_v38 = vpop.f32.mrf.mxu0 }
 0x190   : > { %v1749_v34 = vpop.f32.mrf.mxu1 }
 0x191   : > { %v5249_v22 = vadd.f32 %v3696_v32, %v1830_v21  ;;  %v1828_v27 = vadd.f32 %v1749_v34, %v5127_v56  ;;  %v1980_v3 = vpop.f32.mrf.mxu0 }
 0x192   : > { %v3663_v35 = vpop.f32.mrf.mxu1 }
 0x193   : > { %v5252_v63 = vadd.f32 %v1977_v46, %v1828_v27  ;;  %v1831_v40 = vadd.f32 %v3663_v35, %v5136_v43  ;;  %v3700_v9 = vpop.f32.mrf.mxu0 }
 0x194   : > { %v1752_v39 = vpop.f32.mrf.mxu1 }
 0x195   : > { %v5255_v53 = vadd.f32 %v3697_v38, %v1831_v40  ;;  %v1829_v18 = vadd.f32 %v1752_v39, %v5141_v59  ;;  %v1993_v36 = vpop.f32.mrf.mxu0 }
 0x196   : > { %v3666_v23 = vpop.f32.mrf.mxu1 }
 0x197   : > { %5765 = vst [vmem:[#allocation12_spill] sm:$0xff] %v5255_v53  ;;  %v5258_v49 = vadd.f32 %v1980_v3, %v1829_v18  ;;  %v1834_v6 = vadd.f32 %v3666_v23, %v5147_v20  ;;  %v3701_v14 = vpop.f32.mrf.mxu0 }
 0x198   : > { %v1765_v56 = vpop.f32.mrf.mxu1 }
 0x199   : > { %5766 = vst [vmem:[#allocation10_spill] sm:$0xff] %v5258_v49  ;;  %v5261_v1 = vadd.f32 %v3700_v9, %v1834_v6  ;;  %v1832_v13 = vadd.f32 %v1765_v56, %v5150_v55  ;;  %v1996_v42 = vpop.f32.mrf.mxu0 }
 0x19a   : > { %v3667_v43 = vpop.f32.mrf.mxu1 }
 0x19b   : > { %5767 = vst [vmem:[#allocation14_spill] sm:$0xff] %v5261_v1  ;;  %v5264_v52 = vadd.f32 %v1993_v36, %v1832_v13  ;;  %v1835_v61 = vadd.f32 %v3667_v43, %v5161_v10  ;;  %v3704_v24 = vpop.f32.mrf.mxu0 }
 0x19c   : > { %v1768_v59 = vpop.f32.mrf.mxu1 }
 0x19d   : > { %5768 = vst [vmem:[#allocation16_spill] sm:$0xff] %v5264_v52  ;;  %v5267_v0 = vadd.f32 %v3701_v14, %v1835_v61  ;;  %v1833_v54 = vadd.f32 %v1768_v59, %v5168_v44  ;;  %v2009_v26 = vpop.f32.mrf.mxu0 }
 0x19e   : > { %v3670_v20 = vpop.f32.mrf.mxu1 }
 0x19f   : > { %5769 = vst [vmem:[#allocation18_spill] sm:$0xff] %v5267_v0  ;;  %v5270_v12 = vadd.f32 %v1996_v42, %v1833_v54  ;;  %v1838_v32 = vadd.f32 %v3670_v20, %v5175_v57  ;;  %v3705_v30 = vpop.f32.mrf.mxu0 }
 0x1a0   : > { %v1781_v55 = vpop.f32.mrf.mxu1 }
 0x1a1   : > { %5770 = vst [vmem:[#allocation22_spill] sm:$0xff] %v5270_v12  ;;  %v5273_v48 = vadd.f32 %v3704_v24, %v1838_v32  ;;  %v1836_v46 = vadd.f32 %v1781_v55, %v5178_v16  ;;  %v2012_v62 = vpop.f32.mrf.mxu0 }
 0x1a2   : > { %v3671_v10 = vpop.f32.mrf.mxu1 }
 0x1a3   : > { %5771 = vst [vmem:[#allocation27_spill] sm:$0xff] %v5273_v48  ;;  %v5276_v21 = vadd.f32 %v2009_v26, %v1836_v46  ;;  %v1839_v38 = vadd.f32 %v3671_v10, %v5182_v31  ;;  %v3708_v34 = vpop.f32.mrf.mxu0 }
 0x1a4   : > { %v1784_v44 = vpop.f32.mrf.mxu1 }
 0x1a5   : > { %5772 = vst [vmem:[#allocation8_spill] sm:$0xff] %v5276_v21  ;;  %v5279_v27 = vadd.f32 %v3705_v30, %v1839_v38  ;;  %v1837_v3 = vadd.f32 %v1784_v44, %v5186_v7  ;;  %v2025_v35 = vpop.f32.mrf.mxu0 }
 0x1a6   : > { %v3674_v57 = vpop.f32.mrf.mxu1 }
 0x1a7   : > { %5773 = vst [vmem:[#allocation13_spill] sm:$0xff] %v5279_v27  ;;  %v5282_v40 = vadd.f32 %v2012_v62, %v1837_v3  ;;  %v1842_v9 = vadd.f32 %v3674_v57, %v5189_v51  ;;  %v3709_v39 = vpop.f32.mrf.mxu0 }
 0x1a8   : > { %v1797_v16 = vpop.f32.mrf.mxu1 }
 0x1a9   : > { %5774 = vst [vmem:[#allocation15_spill] sm:$0xff] %v5282_v40  ;;  %v5285_v18 = vadd.f32 %v3708_v34, %v1842_v9  ;;  %v1840_v36 = vadd.f32 %v1797_v16, %v5192_v50  ;;  %v2028_v23 = vpop.f32.mrf.mxu0 }
 0x1aa   : > { %v3675_v31 = vpop.f32.mrf.mxu1 }
 0x1ab   : > { %5775 = vst [vmem:[#allocation17_spill] sm:$0xff] %v5285_v18  ;;  %v5288_v6 = vadd.f32 %v2025_v35, %v1840_v36  ;;  %v1843_v14 = vadd.f32 %v3675_v31, %v5195_v2  ;;  %v5291_v56 = vpop.f32.mrf.mxu0 }
 0x1ac   : > { %v1800_v7 = vpop.f32.mrf.mxu1 }
 0x1ad   : > { %5776 = vst [vmem:[#allocation20_spill] sm:$0xff] %v5288_v6  ;;  %v5293_v13 = vadd.f32 %v3709_v39, %v1843_v14  ;;  %v1841_v42 = vadd.f32 %v1800_v7, %v5198_v47  ;;  %v5296_v51 = vpop.f32.mrf.mxu0 }
 0x1ae   : > { %v3714_v43 = vpop.f32.mrf.mxu1 }
 0x1af   : > { %5777 = vst [vmem:[#allocation25_spill] sm:$0xff] %v5293_v13  ;;  %v5298_v61 = vadd.f32 %v2028_v23, %v1841_v42  ;;  %v5300_v24 = vpop.f32.mrf.mxu0 }
 0x1b0   : > { %v2125_v50 = vpop.f32.mrf.mxu1 }
 0x1b1   : > { %5778 = vst [vmem:[#allocation28_spill] sm:$0xff] %v5298_v61  ;;  %v5302_v59 = vpop.f32.mrf.mxu0 }
 0x1b2   : > { %v3715_v54 = vpop.f32.mrf.mxu1 }
 0x1b3   : > { %v5304_v26 = vpop.f32.mrf.mxu0 }
 0x1b4   : > { %v5306_v2 = vpop.f32.mrf.mxu1 }
 0x1b5   : > { %v5308_v20 = vpop.f32.mrf.mxu0 }
 0x1b6   : > { %v5310_v32 = vpop.f32.mrf.mxu1 }
 0x1b7   : > { %v5312_v47 = vpop.f32.mrf.mxu0 }
 0x1b8   : > { %v5314_v30 = vpop.f32.mrf.mxu1 }
 0x1b9   : > { %v5316_v55 = vpop.f32.mrf.mxu0 }
 0x1ba   : > { %v5318_v46 = vpop.f32.mrf.mxu1 }
 0x1bb   : > { %v5320_v62 = vpop.f32.mrf.mxu0 }
 0x1bc   : > { %v5322_v10 = vpop.f32.mrf.mxu1 }
 0x1bd   : > { %v5324_v38 = vpop.f32.mrf.mxu0 }
 0x1be   : > { %v5326_v34 = vpop.f32.mrf.mxu1 }
 0x1bf   : > { %v5328_v44 = vpop.f32.mrf.mxu0 }
 0x1c0   : > { %v5330_v3 = vpop.f32.mrf.mxu1 }
 0x1c1   : > { %v5332_v35 = vpop.f32.mrf.mxu0 }
 0x1c2   : > { %v5334_v57 = vpop.f32.mrf.mxu1 }
 0x1c3   : > { %v5336_v9 = vpop.f32.mrf.mxu0 }
 0x1c4   : > { %v5338_v39 = vpop.f32.mrf.mxu1 }
 0x1c5   : > { %v5340_v16 = vpop.f32.mrf.mxu0 }
 0x1c6   : > { %v5342_v36 = vpop.f32.mrf.mxu1 }
 0x1c7   : > { %v5344_v23 = vpop.f32.mrf.mxu0 }
 0x1c8   : > { %v5346_v31 = vpop.f32.mrf.mxu1 }
 0x1c9   : > { %v5348_v14 = vpop.f32.mrf.mxu0 }
 0x1ca   : > { %v5350_v7 = vpop.f32.mrf.mxu1 }
 0x1cb   : > { %v5352_v42 = vpop.f32.mrf.mxu0 }
 0x1cc   : > { %v5354_v61 = vpop.f32.mrf.mxu1 }
 0x1cd   : > { %v5356_v13 = vpop.f32.mrf.mxu0 }
 0x1ce   : > { %5779 = vst [vmem:[#allocation5_spill] sm:$0xff] %v5356_v13  ;;  %v5358_v6 = vpop.f32.mrf.mxu1 }
 0x1cf   : > { %v5360_v18 = vpop.f32.mrf.mxu0 }
 0x1d0   : > { %5780 = vst [vmem:[#allocation23_spill] sm:$0xff] %v5360_v18  ;;  %v5362_v40 = vpop.f32.mrf.mxu1 }
 0x1d1   : > { %v5364_v27 = vpop.f32.mrf.mxu0 }
 0x1d2   : > { %5781 = vst [vmem:[#allocation19_spill] sm:$0xff] %v5364_v27  ;;  %v5366_v21 = vpop.f32.mrf.mxu1 }
 0x1d3   : > { %5782 = vst [vmem:[#allocation21_spill] sm:$0xff] %v5366_v21  ;;  %v5368_v48 = vpop.f32.mrf.mxu0 }
 0x1d4   : > { %5783 = vst [vmem:[#allocation24_spill] sm:$0xff] %v5368_v48  ;;  %v5370_v12 = vpop.f32.mrf.mxu1 }
 0x1d5   : > { %5784 = vst [vmem:[#allocation26_spill] sm:$0xff] %v5370_v12  ;;  %v5372_v0 = vpop.f32.mrf.mxu0 }
 0x1d6   : > { %5785 = vst [vmem:[#allocation11_spill] sm:$0xff] %v5372_v0  ;;  %v5374_v52 = vpop.f32.mrf.mxu1 }
 0x1d7   : > { %5786 = vst [vmem:[#allocation6_spill] sm:$0xff] %v5374_v52  ;;  %v5376_v1 = vpop.f32.mrf.mxu0 }
 0x1d8   : > { %5787 = vst [vmem:[#allocation7_spill] sm:$0xff] %v5376_v1  ;;  %v5378_v49 = vpop.f32.mrf.mxu1 }
 0x1d9   : > { %5788 = vst [vmem:[#allocation9_spill] sm:$0xff] %v5378_v49  ;;  %v5380_v13 = vpop.f32.mrf.mxu0 }
 0x1da   : > { %5789 = vst [vmem:[#allocation29_spill] sm:$0xff] %v5380_v13  ;;  %v5382_v18 = vpop.f32.mrf.mxu1 }
 0x1db   : > { %5790 = vst [vmem:[#allocation30_spill] sm:$0xff] %v5382_v18  ;;  %v5384_v53 = vpop.f32.mrf.mxu0 }
 0x1dc   : > { %5791 = vst [vmem:[#allocation31_spill] sm:$0xff] %v5384_v53  ;;  %v5386_v27 = vpop.f32.mrf.mxu1 }
 0x1dd   : > { %5792 = vst [vmem:[#allocation32_spill] sm:$0xff] %v5386_v27  ;;  %v5388_v21 = vpop.f32.mrf.mxu0 }
 0x1de   : > { %5793 = vst [vmem:[#allocation33_spill] sm:$0xff] %v5388_v21  ;;  %v5390_v48 = vpop.f32.mrf.mxu1 }
 0x1df   : > { %5794 = vst [vmem:[#allocation34_spill] sm:$0xff] %v5390_v48  ;;  %v5392_v12 = vpop.f32.mrf.mxu0 }
 0x1e0   : > { %5795 = vst [vmem:[#allocation35_spill] sm:$0xff] %v5392_v12  ;;  %v5394_v0 = vpop.f32.mrf.mxu1  ;;  %v2254_v12 = vadd.f32 %v3714_v43, %v5201_v29  ;;  %v2253_v29 = vadd.f32 %v5306_v2, %v5210_v4  ;;  %v2256_v4 = vadd.f32 %v5314_v30, %v5216_v5 }
 0x1e1   : > { %5796 = vst [vmem:[#allocation36_spill] sm:$0xff] %v5394_v0  ;;  %v5396_v52 = vpop.f32.mrf.mxu0 }
 0x1e2   : > { %5797 = vst [vmem:[#allocation37_spill] sm:$0xff] %v5396_v52  ;;  %v5398_v1 = vpop.f32.mrf.mxu1  ;;  %v2462_v30 = vadd.f32 %v5308_v20, %v2256_v4  ;;  %v2262_v20 = vadd.f32 %v5326_v34, %v5225_v11 }
 0x1e3   : > { %5798 = vst [vmem:[#allocation38_spill] sm:$0xff] %v5398_v1  ;;  %v5400_v49 = vpop.f32.mrf.mxu0  ;;  %v2252_v1 = vadd.f32 %v2125_v50, %v5204_v15  ;;  %v2258_v15 = vadd.f32 %v5310_v32, %v5213_v41  ;;  %v5431_v50 = vld [vmem:[%s5643_s2] ss:$0 sm:$0xff] }
 0x1e4   : > { %5799 = vst [vmem:[#allocation39_spill] sm:$0xff] %v5400_v49  ;;  %v5402_v13 = vpop.f32.mrf.mxu1 }
 0x1e5   : > { %5800 = vst [vmem:[#allocation40_spill] sm:$0xff] %v5402_v13  ;;  %v5404_v53 = vpop.f32.mrf.mxu0 }
 0x1e6   : > { %5801 = vst [vmem:[#allocation41_spill] sm:$0xff] %v5404_v53  ;;  %v5406_v27 = vpop.f32.mrf.mxu1  ;;  %v2460_v53 = vadd.f32 %v5291_v56, %v2254_v12 }
 0x1e7   : > { %5802 = vst [vmem:[#allocation42_spill] sm:$0xff] %v5406_v27  ;;  %v5408_v21 = vpop.f32.mrf.mxu0  ;;  %v2255_v27 = vadd.f32 %v3715_v54, %v5207_v58 }
 0x1e8   : > { %5803 = vst [vmem:[#allocation43_spill] sm:$0xff] %v5408_v21  ;;  %v5410_v48 = vpop.f32.mrf.mxu1 }
 0x1e9   : > { %5804 = vst [vmem:[#allocation44_spill] sm:$0xff] %v5410_v48  ;;  %v5413_v0 = vpop.f32.mrf.mxu0  ;;  %v2458_v48 = vadd.f32 %v5296_v51, %v2252_v1  ;;  %v2461_v58 = vadd.f32 %v5300_v24, %v2255_v27  ;;  %v2259_v27 = vadd.f32 %v5318_v46, %v5219_v45 }
 0x1ea   : > { %5805 = vst [vmem:[#allocation45_spill] sm:$0xff] %v5413_v0  ;;  %v5415_v52 = vpop.f32.mrf.mxu1 }
 0x1eb   : > { %v3816_v49 = vpop.f32.mrf.mxu0 }
 0x1ec   : > { %v5418_v18 = vpop.f32.mrf.mxu1 }
 0x1ed   : > { %5806 = vst [vmem:[#allocation46_spill] sm:$0xff] %v5418_v18  ;;  %v2771_v13 = vpop.f32.mrf.mxu0  ;;  %v2464_v18 = vadd.f32 %v5304_v26, %v2258_v15  ;;  %v2465_v15 = vadd.f32 %v5312_v47, %v2259_v27 }
 0x1ee   : > { %v3782_v21 = vpop.f32.mrf.mxu1 }
 0x1ef   : > { %v2688_v43 = vadd.f32 %v3782_v21, %v2460_v53  ;;  %v3817_v0 = vpop.f32.mrf.mxu0  ;;  %v2459_v21 = vadd.f32 %v5302_v59, %v2253_v29  ;;  %v2257_v59 = vadd.f32 %v5322_v10, %v5222_v8 }
 0x1f0   : > { %v2559_v12 = vpop.f32.mrf.mxu1 }
 0x1f1   : > { %v2900_v56 = vadd.f32 %v3816_v49, %v2688_v43  ;;  %v2686_v1 = vadd.f32 %v2559_v12, %v2458_v48  ;;  %v2774_v51 = vpop.f32.mrf.mxu0 }
 0x1f2   : > { %v3783_v53 = vpop.f32.mrf.mxu1 }
 0x1f3   : > { %v2939_v41 = vadd.f32 %v5431_v50, %v2900_v56  ;;  %v2898_v54 = vadd.f32 %v2771_v13, %v2686_v1  ;;  %v2689_v2 = vadd.f32 %v3783_v53, %v2461_v58  ;;  %v3820_v32 = vpop.f32.mrf.mxu0  ;;  %v2463_v53 = vadd.f32 %v5316_v55, %v2257_v59 }
 0x1f4   : > { %v2562_v24 = vpop.f32.mrf.mxu1  ;;  %v2266_v59 = vadd.f32 %v5342_v36, %v5237_v19 }
 0x1f5   : > { %v2971_v49 = vmax.f32 %v2939_v41, 0.0  ;;  %v2937_v48 = vadd.f32 %v5431_v50, %v2898_v54  ;;  %v2901_v43 = vadd.f32 %v3817_v0, %v2689_v2  ;;  %v2687_v12 = vadd.f32 %v2562_v24, %v2459_v21  ;;  %v2787_v5 = vpop.f32.mrf.mxu0 }
 0x1f6   : > { %v3786_v13 = vpop.f32.mrf.mxu1  ;;  %v2468_v54 = vadd.f32 %v5320_v62, %v2262_v20  ;;  %v2263_v2 = vadd.f32 %v5334_v57, %v5231_v33 }
 0x1f7   : > { %3003 = vst [vmem:[%s5447_s9 + $0x10] sm:$0xff] %v2971_v49  ;;  %v2969_v26 = vmax.f32 %v2937_v48, 0.0  ;;  %v2940_v45 = vadd.f32 %v5431_v50, %v2901_v43  ;;  %v2899_v46 = vadd.f32 %v2774_v51, %v2687_v12  ;;  %v2692_v29 = vadd.f32 %v3786_v13, %v2464_v18  ;;  %v3821_v0 = vpop.f32.mrf.mxu0 }
 0x1f8   : > { %v2575_v58 = vpop.f32.mrf.mxu1  ;;  %v2260_v18 = vadd.f32 %v5330_v3, %v5228_v60  ;;  %v2261_v48 = vadd.f32 %v5338_v39, %v5234_v17 }
 0x1f9   : > { %3001 = vst [vmem:[%s5447_s9] sm:$0xff] %v2969_v26  ;;  %v2972_v8 = vmax.f32 %v2940_v45, 0.0  ;;  %v2938_v10 = vadd.f32 %v5431_v50, %v2899_v46  ;;  %v2904_v56 = vadd.f32 %v3820_v32, %v2692_v29  ;;  %v2690_v1 = vadd.f32 %v2575_v58, %v2462_v30  ;;  %v2790_v4 = vpop.f32.mrf.mxu0 }
 0x1fa   : > { %v3787_v51 = vpop.f32.mrf.mxu1  ;;  %v2466_v49 = vadd.f32 %v5324_v38, %v2260_v18  ;;  %v2469_v30 = vadd.f32 %v5328_v44, %v2263_v2  ;;  %v2467_v46 = vadd.f32 %v5332_v35, %v2261_v48  ;;  %v2264_v29 = vadd.f32 %v5346_v31, %v5240_v25 }
 0x1fb   : > { %3004 = vst [vmem:[%s5447_s9 + $0x18] sm:$0xff] %v2972_v8  ;;  %v2970_v47 = vmax.f32 %v2938_v10, 0.0  ;;  %v2943_v21 = vadd.f32 %v5431_v50, %v2904_v56  ;;  %v2902_v11 = vadd.f32 %v2787_v5, %v2690_v1  ;;  %v2693_v34 = vadd.f32 %v3787_v51, %v2465_v15  ;;  %v3824_v41 = vpop.f32.mrf.mxu0 }
 0x1fc   : > { %v2578_v32 = vpop.f32.mrf.mxu1  ;;  %v2472_v58 = vadd.f32 %v5336_v9, %v2266_v59  ;;  %v2267_v8 = vadd.f32 %v5350_v7, %v5243_v37 }
 0x1fd   : > { %3002 = vst [vmem:[%s5447_s9 + $0x8] sm:$0xff] %v2970_v47  ;;  %v2975_v55 = vmax.f32 %v2943_v21, 0.0  ;;  %v2941_v27 = vadd.f32 %v5431_v50, %v2902_v11  ;;  %v2905_v60 = vadd.f32 %v3821_v0, %v2693_v34  ;;  %v2691_v3 = vadd.f32 %v2578_v32, %v2463_v53  ;;  %v2803_v24 = vpop.f32.mrf.mxu0 }
 0x1fe   : > { %v3790_v43 = vpop.f32.mrf.mxu1  ;;  %v2265_v53 = vadd.f32 %v5354_v61, %v5246_v28  ;;  %v2473_v21 = vadd.f32 %v5344_v23, %v2267_v8  ;;  %v2270_v11 = vadd.f32 %v5358_v6, %v5249_v22  ;;  %v2268_v32 = vadd.f32 %v5362_v40, %v5252_v63 }
 0x1ff   : > { %3007 = vst [vmem:[%s5447_s9 + $0x30] sm:$0xff] %v2975_v55  ;;  %v2973_v62 = vmax.f32 %v2941_v27, 0.0  ;;  %v2944_v12 = vadd.f32 %v5431_v50, %v2905_v60  ;;  %v2903_v33 = vadd.f32 %v2790_v4, %v2691_v3  ;;  %v2696_v57 = vadd.f32 %v3790_v43, %v2468_v54  ;;  %v3825_v5 = vpop.f32.mrf.mxu0 }
 0x200   : > { %v2591_v13 = vpop.f32.mrf.mxu1  ;;  %v2470_v4 = vadd.f32 %v5340_v16, %v2264_v29  ;;  %v2471_v2 = vadd.f32 %v5348_v14, %v2265_v53  ;;  %v2476_v3 = vadd.f32 %v5352_v42, %v2270_v11  ;;  %v5813_v29 = vld [vmem:[#allocation14_spill] sm:$0xff] }
 0x201   : > { %3005 = vst [vmem:[%s5447_s9 + $0x20] sm:$0xff] %v2973_v62  ;;  %v2976_v38 = vmax.f32 %v2944_v12, 0.0  ;;  %v2942_v26 = vadd.f32 %v5431_v50, %v2903_v33  ;;  %v2908_v17 = vadd.f32 %v3824_v41, %v2696_v57  ;;  %v2694_v39 = vadd.f32 %v2591_v13, %v2466_v49  ;;  %v2806_v45 = vpop.f32.mrf.mxu0  ;;  %v5808_v49 = vld [vmem:[#allocation21_spill] sm:$0xff] }
 0x202   : > { %v3791_v0 = vpop.f32.mrf.mxu1  ;;  %v5809_v33 = vld [vmem:[#allocation5_spill] sm:$0xff] }
 0x203   : > { %3008 = vst [vmem:[%s5447_s9 + $0x38] sm:$0xff] %v2976_v38  ;;  %v2974_v44 = vmax.f32 %v2942_v26, 0.0  ;;  %v2947_v15 = vadd.f32 %v5431_v50, %v2908_v17  ;;  %v2906_v19 = vadd.f32 %v2803_v24, %v2694_v39  ;;  %v2697_v36 = vadd.f32 %v3791_v0, %v2469_v30  ;;  %v3828_v20 = vpop.f32.mrf.mxu0  ;;  %v5807_v24 = vld [vmem:[#allocation12_spill] sm:$0xff]  ;;  %v5811_v30 = vld [vmem:[#allocation26_spill] sm:$0xff] }
 0x204   : > { %v2594_v10 = vpop.f32.mrf.mxu1  ;;  %v2271_v48 = vadd.f32 %v5808_v49, %v5807_v24  ;;  %v2474_v57 = vadd.f32 %v5809_v33, %v2268_v32  ;;  %v5814_v0 = vld [vmem:[#allocation6_spill] sm:$0xff] }
 0x205   : > { %3006 = vst [vmem:[%s5447_s9 + $0x28] sm:$0xff] %v2974_v44  ;;  %v2979_v35 = vmax.f32 %v2947_v15, 0.0  ;;  %v2945_v56 = vadd.f32 %v5431_v50, %v2906_v19  ;;  %v2909_v25 = vadd.f32 %v3825_v5, %v2697_v36  ;;  %v2695_v31 = vadd.f32 %v2594_v10, %v2467_v46  ;;  %v2819_v1 = vpop.f32.mrf.mxu0  ;;  %v5810_v5 = vld [vmem:[#allocation10_spill] sm:$0xff]  ;;  %v5815_v10 = vld [vmem:[#allocation19_spill] sm:$0xff] }
 0x206   : > { %v3794_v18 = vpop.f32.mrf.mxu1  ;;  %v2269_v59 = vadd.f32 %v5811_v30, %v5810_v5  ;;  %v2274_v44 = vadd.f32 %v5814_v0, %v5813_v29 }
 0x207   : > { %3011 = vst [vmem:[%s5447_s9 + $0x50] sm:$0xff] %v2979_v35  ;;  %v2977_v9 = vmax.f32 %v2945_v56, 0.0  ;;  %v2948_v51 = vadd.f32 %v5431_v50, %v2909_v25  ;;  %v2907_v37 = vadd.f32 %v2806_v45, %v2695_v31  ;;  %v2700_v7 = vadd.f32 %v3794_v18, %v2472_v58  ;;  %v3829_v47 = vpop.f32.mrf.mxu0  ;;  %v5812_v45 = vld [vmem:[#allocation23_spill] sm:$0xff]  ;;  %v5816_v56 = vld [vmem:[#allocation16_spill] sm:$0xff]  ;;  %v5817_v25 = vld [vmem:[#allocation9_spill] sm:$0xff] }
 0x208   : > { %v2607_v34 = vpop.f32.mrf.mxu1  ;;  %v2477_v46 = vadd.f32 %v5812_v45, %v2271_v48  ;;  %v2475_v35 = vadd.f32 %v5815_v10, %v2269_v59  ;;  %v2272_v31 = vadd.f32 %v5817_v25, %v5816_v56  ;;  %v5824_v48 = vld [vmem:[#allocation7_spill] sm:$0xff]  ;;  %v5827_v59 = vld [vmem:[#allocation29_spill] sm:$0xff] }
 0x209   : > { %3009 = vst [vmem:[%s5447_s9 + $0x40] sm:$0xff] %v2977_v9  ;;  %v2980_v16 = vmax.f32 %v2948_v51, 0.0  ;;  %v2946_v41 = vadd.f32 %v5431_v50, %v2907_v37  ;;  %v2912_v28 = vadd.f32 %v3828_v20, %v2700_v7  ;;  %v2698_v61 = vadd.f32 %v2607_v34, %v2470_v4  ;;  %v2822_v54 = vpop.f32.mrf.mxu0  ;;  %v5818_v37 = vld [vmem:[#allocation24_spill] sm:$0xff] }
 0x20a   : > { %v3795_v55 = vpop.f32.mrf.mxu1  ;;  %v2480_v7 = vadd.f32 %v5818_v37, %v2274_v44  ;;  %v5830_v44 = vld [vmem:[#allocation31_spill] sm:$0xff] }
 0x20b   : > { %3012 = vst [vmem:[%s5447_s9 + $0x58] sm:$0xff] %v2980_v16  ;;  %v2978_v23 = vmax.f32 %v2946_v41, 0.0  ;;  %v2951_v27 = vadd.f32 %v5431_v50, %v2912_v28  ;;  %v2910_v22 = vadd.f32 %v2819_v1, %v2698_v61  ;;  %v2701_v6 = vadd.f32 %v3795_v55, %v2473_v21  ;;  %v3832_v60 = vpop.f32.mrf.mxu0  ;;  %v5820_v21 = vld [vmem:[#allocation30_spill] sm:$0xff] }
 0x20c   : > { %v2610_v43 = vpop.f32.mrf.mxu1  ;;  %v5822_v55 = vld [vmem:[#allocation22_spill] sm:$0xff] }
 0x20d   : > { %3010 = vst [vmem:[%s5447_s9 + $0x48] sm:$0xff] %v2978_v23  ;;  %v2983_v14 = vmax.f32 %v2951_v27, 0.0  ;;  %v2949_v62 = vadd.f32 %v5431_v50, %v2910_v22  ;;  %v2913_v63 = vadd.f32 %v3829_v47, %v2701_v6  ;;  %v2699_v40 = vadd.f32 %v2610_v43, %v2471_v2  ;;  %v2835_v12 = vpop.f32.mrf.mxu0  ;;  %v5819_v47 = vld [vmem:[#allocation18_spill] sm:$0xff]  ;;  %v5821_v2 = vld [vmem:[#allocation11_spill] sm:$0xff]  ;;  %v5823_v23 = vld [vmem:[#allocation32_spill] sm:$0xff] }
 0x20e   : > { %v3798_v13 = vpop.f32.mrf.mxu1  ;;  %v2275_v11 = vadd.f32 %v5820_v21, %v5819_v47  ;;  %v2478_v32 = vadd.f32 %v5821_v2, %v2272_v31  ;;  %v2273_v27 = vadd.f32 %v5823_v23, %v5822_v55  ;;  %v5833_v31 = vld [vmem:[#allocation33_spill] sm:$0xff] }
 0x20f   : > { %3015 = vst [vmem:[%s5447_s9 + $0x70] sm:$0xff] %v2983_v14  ;;  %v2981_v42 = vmax.f32 %v2949_v62, 0.0  ;;  %v2952_v38 = vadd.f32 %v5431_v50, %v2913_v63  ;;  %v2911_v26 = vadd.f32 %v2822_v54, %v2699_v40  ;;  %v2704_v17 = vadd.f32 %v3798_v13, %v2476_v3  ;;  %v3833_v39 = vpop.f32.mrf.mxu0  ;;  %v5825_v14 = vld [vmem:[#allocation27_spill] sm:$0xff]  ;;  %v5826_v62 = vld [vmem:[#allocation34_spill] sm:$0xff] }
 0x210   : > { %v2623_v15 = vpop.f32.mrf.mxu1  ;;  %v2481_v43 = vadd.f32 %v5824_v48, %v2275_v11  ;;  %v2278_v63 = vadd.f32 %v5826_v62, %v5825_v14  ;;  %v2479_v13 = vadd.f32 %v5827_v59, %v2273_v27  ;;  %v5836_v11 = vld [vmem:[#allocation35_spill] sm:$0xff]  ;;  %v5839_v27 = vld [vmem:[#allocation37_spill] sm:$0xff] }
 0x211   : > { %3013 = vst [vmem:[%s5447_s9 + $0x60] sm:$0xff] %v2981_v42  ;;  %v2984_v19 = vmax.f32 %v2952_v38, 0.0  ;;  %v2950_v36 = vadd.f32 %v5431_v50, %v2911_v26  ;;  %v2916_v20 = vadd.f32 %v3832_v60, %v2704_v17  ;;  %v2702_v58 = vadd.f32 %v2623_v15, %v2474_v57  ;;  %v2838_v8 = vpop.f32.mrf.mxu0  ;;  %v5828_v42 = vld [vmem:[#allocation8_spill] sm:$0xff] }
 0x212   : > { %v3799_v1 = vpop.f32.mrf.mxu1  ;;  %v5829_v38 = vld [vmem:[#allocation36_spill] sm:$0xff]  ;;  %v2484_v15 = vadd.f32 %v5830_v44, %v2278_v63  ;;  %v5842_v63 = vld [vmem:[#allocation39_spill] sm:$0xff] }
 0x213   : > { %3016 = vst [vmem:[%s5447_s9 + $0x78] sm:$0xff] %v2984_v19  ;;  %v2982_v4 = vmax.f32 %v2950_v36, 0.0  ;;  %v2955_v53 = vadd.f32 %v5431_v50, %v2916_v20  ;;  %v2914_v18 = vadd.f32 %v2835_v12, %v2702_v58  ;;  %v2705_v9 = vadd.f32 %v3799_v1, %v2477_v46  ;;  %v3836_v51 = vpop.f32.mrf.mxu0  ;;  %v5831_v19 = vld [vmem:[#allocation13_spill] sm:$0xff]  ;;  %v5832_v36 = vld [vmem:[#allocation38_spill] sm:$0xff] }
 0x214   : > { %v2626_v34 = vpop.f32.mrf.mxu1  ;;  %v2276_v26 = vadd.f32 %v5829_v38, %v5828_v42  ;;  %v2279_v20 = vadd.f32 %v5832_v36, %v5831_v19  ;;  %v5844_v42 = vld [vmem:[#allocation41_spill] sm:$0xff] }
 0x215   : > { %3014 = vst [vmem:[%s5447_s9 + $0x68] sm:$0xff] %v2982_v4  ;;  %v2987_v16 = vmax.f32 %v2955_v53, 0.0  ;;  %v2953_v41 = vadd.f32 %v5431_v50, %v2914_v18  ;;  %v2917_v28 = vadd.f32 %v3833_v39, %v2705_v9  ;;  %v2703_v61 = vadd.f32 %v2626_v34, %v2475_v35  ;;  %v2851_v54 = vpop.f32.mrf.mxu0  ;;  %v5834_v4 = vld [vmem:[#allocation15_spill] sm:$0xff]  ;;  %v5835_v53 = vld [vmem:[#allocation40_spill] sm:$0xff] }
 0x216   : > { %v3802_v22 = vpop.f32.mrf.mxu1  ;;  %v2482_v1 = vadd.f32 %v5833_v31, %v2276_v26  ;;  %v2277_v18 = vadd.f32 %v5835_v53, %v5834_v4  ;;  %v2485_v34 = vadd.f32 %v5836_v11, %v2279_v20  ;;  %v5845_v26 = vld [vmem:[#allocation28_spill] sm:$0xff] }
 0x217   : > { %3019 = vst [vmem:[%s5447_s9 + $0x90] sm:$0xff] %v2987_v16  ;;  %v2985_v6 = vmax.f32 %v2953_v41, 0.0  ;;  %v2956_v60 = vadd.f32 %v5431_v50, %v2917_v28  ;;  %v2915_v3 = vadd.f32 %v2838_v8, %v2703_v61  ;;  %v2708_v24 = vadd.f32 %v3802_v22, %v2480_v7  ;;  %v3837_v49 = vpop.f32.mrf.mxu0  ;;  %v5837_v16 = vld [vmem:[#allocation17_spill] sm:$0xff]  ;;  %v5838_v41 = vld [vmem:[#allocation42_spill] sm:$0xff] }
 0x218   : > { %v2639_v40 = vpop.f32.mrf.mxu1  ;;  %v2282_v28 = vadd.f32 %v5838_v41, %v5837_v16  ;;  %v2483_v22 = vadd.f32 %v5839_v27, %v2277_v18 }
 0x219   : > { %3017 = vst [vmem:[%s5447_s9 + $0x80] sm:$0xff] %v2985_v6  ;;  %v2988_v12 = vmax.f32 %v2956_v60, 0.0  ;;  %v2954_v33 = vadd.f32 %v5431_v50, %v2915_v3  ;;  %v2920_v57 = vadd.f32 %v3836_v51, %v2708_v24  ;;  %v2706_v5 = vadd.f32 %v2639_v40, %v2478_v32  ;;  %v2854_v30 = vpop.f32.mrf.mxu0  ;;  %v5840_v6 = vld [vmem:[#allocation20_spill] sm:$0xff] }
 0x21a   : > { %v3803_v17 = vpop.f32.mrf.mxu1  ;;  %v5841_v60 = vld [vmem:[#allocation44_spill] sm:$0xff]  ;;  %v2488_v40 = vadd.f32 %v5842_v63, %v2282_v28 }
 0x21b   : > { %3020 = vst [vmem:[%s5447_s9 + $0x98] sm:$0xff] %v2988_v12  ;;  %v2986_v39 = vmax.f32 %v2954_v33, 0.0  ;;  %v2959_v45 = vadd.f32 %v5431_v50, %v2920_v57  ;;  %v2918_v46 = vadd.f32 %v2851_v54, %v2706_v5  ;;  %v2709_v29 = vadd.f32 %v3803_v17, %v2481_v43  ;;  %v3840_v0 = vpop.f32.mrf.mxu0  ;;  %v5843_v12 = vld [vmem:[#allocation25_spill] sm:$0xff]  ;;  %v5846_v17 = vld [vmem:[#allocation46_spill] sm:$0xff] }
 0x21c   : > { %v2642_v58 = vpop.f32.mrf.mxu1  ;;  %v2280_v3 = vadd.f32 %v5841_v60, %v5840_v6  ;;  %v2283_v33 = vadd.f32 %v5415_v52, %v5843_v12 }
 0x21d   : > { %3018 = vst [vmem:[%s5447_s9 + $0x88] sm:$0xff] %v2986_v39  ;;  %v2991_v8 = vmax.f32 %v2959_v45, 0.0  ;;  %v2957_v10 = vadd.f32 %v5431_v50, %v2918_v46  ;;  %v2921_v35 = vadd.f32 %v3837_v49, %v2709_v29  ;;  %v2707_v56 = vadd.f32 %v2642_v58, %v2479_v13  ;;  %v2867_v25 = vpop.f32.mrf.mxu0 }
 0x21e   : > { %v3806_v9 = vpop.f32.mrf.mxu1  ;;  %v2486_v38 = vadd.f32 %v5844_v42, %v2280_v3  ;;  %v2281_v39 = vadd.f32 %v5846_v17, %v5845_v26 }
 0x21f   : > { %3023 = vst [vmem:[%s5447_s9 + $0xb0] sm:$0xff] %v2991_v8  ;;  %v2989_v51 = vmax.f32 %v2957_v10, 0.0  ;;  %v2960_v37 = vadd.f32 %v5431_v50, %v2921_v35  ;;  %v2919_v7 = vadd.f32 %v2854_v30, %v2707_v56  ;;  %v2712_v47 = vadd.f32 %v3806_v9, %v2484_v15  ;;  %v3841_v21 = vpop.f32.mrf.mxu0  ;;  %v5847_v15 = vld [vmem:[#allocation43_spill] sm:$0xff]  ;;  %v5848_v35 = vld [vmem:[#allocation45_spill] sm:$0xff] }
 0x220   : > { %v2655_v61 = vpop.f32.mrf.mxu1  ;;  %v2489_v19 = vadd.f32 %v5847_v15, %v2283_v33  ;;  %v2487_v56 = vadd.f32 %v5848_v35, %v2281_v39 }
 0x221   : > { %3021 = vst [vmem:[%s5447_s9 + $0xa0] sm:$0xff] %v2989_v51  ;;  %v2992_v54 = vmax.f32 %v2960_v37, 0.0  ;;  %v2958_v2 = vadd.f32 %v5431_v50, %v2919_v7  ;;  %v2924_v32 = vadd.f32 %v3840_v0, %v2712_v47  ;;  %v2710_v55 = vadd.f32 %v2655_v61, %v2482_v1  ;;  %v2870_v23 = vpop.f32.mrf.mxu0 }
 0x222   : > { %v3807_v24 = vpop.f32.mrf.mxu1 }
 0x223   : > { %3024 = vst [vmem:[%s5447_s9 + $0xb8] sm:$0xff] %v2992_v54  ;;  %v2990_v49 = vmax.f32 %v2958_v2, 0.0  ;;  %v2963_v48 = vadd.f32 %v5431_v50, %v2924_v32  ;;  %v2922_v43 = vadd.f32 %v2867_v25, %v2710_v55  ;;  %v2713_v14 = vadd.f32 %v3807_v24, %v2485_v34  ;;  %v3844_v62 = vpop.f32.mrf.mxu0 }
 0x224   : > { %v2658_v57 = vpop.f32.mrf.mxu1 }
 0x225   : > { %3022 = vst [vmem:[%s5447_s9 + $0xa8] sm:$0xff] %v2990_v49  ;;  %v2995_v5 = vmax.f32 %v2963_v48, 0.0  ;;  %v2961_v30 = vadd.f32 %v5431_v50, %v2922_v43  ;;  %v2925_v59 = vadd.f32 %v3841_v21, %v2713_v14  ;;  %v2711_v13 = vadd.f32 %v2658_v57, %v2483_v22  ;;  %v2883_v46 = vpop.f32.mrf.mxu0 }
 0x226   : > { %v3810_v45 = vpop.f32.mrf.mxu1 }
 0x227   : > { %3027 = vst [vmem:[%s5447_s9 + $0xd0] sm:$0xff] %v2995_v5  ;;  %v2993_v29 = vmax.f32 %v2961_v30, 0.0  ;;  %v2964_v52 = vadd.f32 %v5431_v50, %v2925_v59  ;;  %v2923_v0 = vadd.f32 %v2870_v23, %v2711_v13  ;;  %v2716_v44 = vadd.f32 %v3810_v45, %v2488_v40  ;;  %v3845_v31 = vpop.f32.mrf.mxu0 }
 0x228   : > { %v2671_v36 = vpop.f32.mrf.mxu1 }
 0x229   : > { %3025 = vst [vmem:[%s5447_s9 + $0xc0] sm:$0xff] %v2993_v29  ;;  %v2996_v20 = vmax.f32 %v2964_v52, 0.0  ;;  %v2962_v58 = vadd.f32 %v5431_v50, %v2923_v0  ;;  %v2928_v8 = vadd.f32 %v3844_v62, %v2716_v44  ;;  %v2714_v10 = vadd.f32 %v2671_v36, %v2486_v38  ;;  %v2886_v21 = vpop.f32.mrf.mxu0 }
 0x22a   : > { %v3811_v25 = vpop.f32.mrf.mxu1 }
 0x22b   : > { %3028 = vst [vmem:[%s5447_s9 + $0xd8] sm:$0xff] %v2996_v20  ;;  %v2994_v1 = vmax.f32 %v2962_v58, 0.0  ;;  %v2967_v4 = vadd.f32 %v5431_v50, %v2928_v8  ;;  %v2926_v53 = vadd.f32 %v2883_v46, %v2714_v10  ;;  %v2717_v18 = vadd.f32 %v3811_v25, %v2489_v19 }
 0x22c   : > { %v2674_v9 = vpop.f32.mrf.mxu1 }
 0x22d   : > { %3026 = vst [vmem:[%s5447_s9 + $0xc8] sm:$0xff] %v2994_v1  ;;  %v2999_v51 = vmax.f32 %v2967_v4, 0.0  ;;  %v2965_v37 = vadd.f32 %v5431_v50, %v2926_v53  ;;  %v2929_v7 = vadd.f32 %v3845_v31, %v2717_v18  ;;  %v2715_v47 = vadd.f32 %v2674_v9, %v2487_v56 }
 0x22f   : > { %3031 = vst [vmem:[%s5447_s9 + $0xf0] sm:$0xff] %v2999_v51  ;;  %v2997_v11 = vmax.f32 %v2965_v37, 0.0  ;;  %v2968_v34 = vadd.f32 %v5431_v50, %v2929_v7  ;;  %v2927_v16 = vadd.f32 %v2886_v21, %v2715_v47 }
 0x231   : > { %3029 = vst [vmem:[%s5447_s9 + $0xe0] sm:$0xff] %v2997_v11  ;;  %v3000_v41 = vmax.f32 %v2968_v34, 0.0  ;;  %v2966_v28 = vadd.f32 %v5431_v50, %v2927_v16 }
 0x233   : > { %3032 = vst [vmem:[%s5447_s9 + $0xf8] sm:$0xff] %v3000_v41  ;;  %v2998_v61 = vmax.f32 %v2966_v28, 0.0 }
 0x235   : > { %3030 = vst [vmem:[%s5447_s9 + $0xe8] sm:$0xff] %v2998_v61 }
 0x236   : > { %3947 = shalt.err (!%p3944_p5)
}
 0x237   : > { %s3948_s29 = scalar_lea.hbm %s5588_s21, 4096  ;;  %s3952_s5 = scalar_lea.hbm %s5644_s3, 8192 }
 0x238   : > { %p3949_p6 = scmp.ne.s32.totalorder %s5588_s21, %s3948_s29  ;;  %p3953_p10 = scmp.lt.s32.totalorder %s5588_s21, %s5644_s3 }
 0x239   : > { %p3954_p11 = scmp.lt.s32.totalorder %s3952_s5, %s3948_s29 }
 0x23a   : > { %p3950_p7 = pnand %p3949_p6, %p4075_p4 }
 0x23b   : > { %p3955_p12 = por %p3954_p11, %p3953_p10 }
 0x23c   : > { %p3951_p9 = pneg %p3950_p7 }
 0x23e   : > { %p3956_p13 = pnand %p3955_p12, %p3951_p9 }
 0x240   : > { %3959 = shalt.err (!%p3956_p13)
}
 0x241   : > { %s4013_s8 = smov 128   ;;  %s4014_s9 = smov 8  }
 0x242   : > { %3859 = dma.vmem_to_hbm [thread:$0]  (%p4075_p4), %s5590_s11, 4096, %s5588_s21, %s5596_s15, %s4013_s8, %s4013_s8, %s4014_s9  }
 0x243 PF: > { %p3865_p0 = scmp.ge.s32.totalorder %s4010_s17, 2  ;;  %s3063_s10 = sand.u32 1, %s3990_s12  }
 0x244   : > { %s3064_s18 = scalar_lea.sflag [#allocation3], %s3063_s10 }
 0x245   : > { %p3862_p1 = pnand %p3865_p0, %p4082_p8 }
 0x247   : > { %p3863_p2 = pneg %p3862_p1 }
 0x249   : > { %3985 = dma.done.wait (%p3863_p2), %s3064_s18, 4096  }
 0x24a   : > { %3987 = vsyncadd (%p3863_p2), %s3064_s18, 4294963200  ;;  %s16_s17 = sadd.s32 1, %s4010_s17   ;;  %s5849_s12 = smov %s3994_s13 }
 0x24b   : > { %p13_p3 = scmp.ge.s32.totalorder %s16_s17, 4   ;;  %s5850_s13 = smov %s3998_s14 }
 0x24c   : > { %s5851_s14 = smov %s4088_s25  ;;  %s5852_s15 = smov %s4006_s16 }
 0x24d   : > { %s5853_s16 = smov %s5855_s20  ;;  %15 = sbr.rel (!%p13_p3) target bundleno = 4 (0x4), region = 81 }
 0x252   :  { %3069 = vsyncpa [#allocation3], 1 }
 0x253   :  { %3071 = vsyncpa [#allocation3 + $0x1], 1 }

</bundles_post_ra>
